<compile_context>
chip_gen: v7x
topology: tpu7x:2x2x1
jax: 0.10.0
libtpu: 0.0.40
codegen_flags: <defaults>
</compile_context>

<pallas_src>
import functools

import jax
import jax.numpy as jnp
from jax import lax
from jax.experimental import pallas as pl
from jax.experimental.pallas import tpu as pltpu


_INF_BITS = 0x7F800000   # bit pattern of +inf; upper bound for finite |score| bits
_N_BISECT = 31           # |score| >= 0 -> sign bit clear -> 31-bit search range


def _plain_head_kernel(x_ref, w_ref, b_ref, out_ref, scores_ref, *, k):
    # x_ref:      (TB, TC, S) VMEM, native input dtype (NCHW slab, no wrapper transpose)
    # w_ref:      (1, TC, 1)  VMEM f32  (1x1 conv weights for this channel chunk)
    # b_ref:      (1,)        SMEM f32  (conv bias)
    # out_ref:    (TB, 1)     VMEM f32
    # scores_ref: (TB, S)     VMEM f32 scratch, accumulated over channel chunks
    c_idx = pl.program_id(1)

    @pl.when(c_idx == 0)
    def _():
        scores_ref[...] = jnp.zeros_like(scores_ref)

    # 1x1 conv channel contraction for this chunk: broadcasted-weight multiply + sum
    # over the channel (second-minor) axis.  No relayout of x; weight lane-broadcasts.
    xb = x_ref[...].astype(jnp.float32)                       # (TB, TC, S)
    scores_ref[...] += jnp.sum(xb * w_ref[...], axis=1)        # (TB, S)

    @pl.when(c_idx == pl.num_programs(1) - 1)
    def _():
        scores = scores_ref[...] + b_ref[0]                    # (TB, S)
        tb = scores.shape[0]

        # |scores| >= 0, so the f32 bit pattern reinterpreted as int32 is order-preserving.
        bits = pltpu.bitcast(jnp.abs(scores), jnp.int32)       # (TB, S)

        # Per-row k-th largest via threshold bisection on the bit pattern.
        # Invariant: count(bits >= lo) >= k and the k-th largest bit pattern lies in [lo, hi].
        kf = jnp.float32(k)
        lo = jnp.zeros((tb, 1), jnp.int32)
        hi = jnp.full((tb, 1), _INF_BITS, jnp.int32)

        def body(_, carry):
            lo, hi = carry
            mid = lo + ((hi - lo + 1) >> 1)                    # ceil midpoint, no overflow
            cnt = jnp.sum((bits >= mid).astype(jnp.float32), axis=-1, keepdims=True)
            ge = cnt >= kf
            return jnp.where(ge, mid, lo), jnp.where(ge, hi, mid - 1)

        lo, _ = lax.fori_loop(0, _N_BISECT, body, (lo, hi), unroll=True)
        thr_bits = lo                                          # bits of k-th largest |score|
        thr = pltpu.bitcast(thr_bits, jnp.float32)             # (TB, 1)

        # mean(top-k) = (sum of values strictly above threshold + threshold * #ties-kept) / k
        # NOTE: NaN scores propagate to NaN output (the reference would also return NaN).
        vals = pltpu.bitcast(bits, jnp.float32)                # == |scores|
        gt = bits > thr_bits                                   # (TB, S)
        n_gt = jnp.sum(gt.astype(jnp.float32), axis=-1, keepdims=True)
        s_gt = jnp.sum(jnp.where(gt, vals, 0.0), axis=-1, keepdims=True)
        topk_sum = s_gt + thr * (kf - n_gt)
        out_ref[...] = topk_sum / kf


def _vmem_budget():
    """Per-generation VMEM sizing: (tile budget bytes, vmem_limit_bytes)."""
    try:
        cap = int(pltpu.get_tpu_info().vmem_capacity_bytes)
    except Exception:
        cap = 64 * 1024 * 1024           # assume the tightest generation (v7x) if unknown
    vmem_limit = min((cap * 3) // 4, 96 * 1024 * 1024)
    # Tiles (double-buffered x block + scores scratch) target ~half the limit, leaving
    # headroom for the weight block, output block, and compiler-internal scratch.
    return vmem_limit // 2, vmem_limit


def _channel_chunks(C):
    # Candidate channel chunk sizes: C itself, plus divisors of C that are multiples
    # of 8 (so the (8,128)-rule holds on the second-minor block dim when TC < C).
    cands = {C}
    for tc in range(8, C, 8):
        if C % tc == 0:
            cands.add(tc)
    return sorted(cands, reverse=True)


def _pick_tiles(B, C, S, x_bytes, budget):
    """Pick (TB, TC) so 2*TB*TC*S*x_bytes (double-buffered x) + TB*S*4 (scratch) fits."""
    if B < 8:
        tbs = [B]
    else:
        cap = min(128, ((B + 7) // 8) * 8)
        tbs = sorted({t for t in (128, 64, 32, 16, 8) if t <= cap} | {cap}, reverse=True)
    cchunks = _channel_chunks(C)
    for TB in tbs:
        for TC in cchunks:
            if 2 * TB * TC * S * x_bytes + TB * S * 4 <= budget:
                return TB, TC
    return tbs[-1], cchunks[-1]          # smallest config; rely on vmem_limit headroom


def plain_head(x_nchw, weight, bias, topk_rate=0.1):
    """Pallas implementation of PlainHead.forward.  Returns (B, 1) float32."""
    B, C, H, W = x_nchw.shape
    S = H * W
    k = max(int(S * topk_rate), 1)

    # Consume NCHW directly: collapsing H,W is layout-free; no transpose, no extra HBM pass.
    x = x_nchw.reshape(B, C, S)
    x_bytes = jnp.dtype(x.dtype).itemsize

    budget, vmem_limit = _vmem_budget()
    TB, TC = _pick_tiles(B, C, S, x_bytes, budget)

    B_pad = ((B + TB - 1) // TB) * TB
    if B_pad != B:
        x = jnp.pad(x, ((0, B_pad - B), (0, 0), (0, 0)))   # padded rows sliced off below

    w = weight.reshape(1, C, 1).astype(jnp.float32)        # (1, C, 1) -> VMEM chunks
    bvec = bias.reshape(1).astype(jnp.float32)             # (1,)      -> SMEM

    grid = (B_pad // TB, C // TC)                          # channel (reduction) axis last

    out = pl.pallas_call(
        functools.partial(_plain_head_kernel, k=k),
        out_shape=jax.ShapeDtypeStruct((B_pad, 1), jnp.float32),
        grid_spec=pltpu.PrefetchScalarGridSpec(
            num_scalar_prefetch=0,
            grid=grid,
            in_specs=[
                pl.BlockSpec((TB, TC, S), lambda i, c: (i, c, 0)),       # x slab (NCHW)
                pl.BlockSpec((1, TC, 1), lambda i, c: (0, c, 0)),        # weight chunk
                pl.BlockSpec(memory_space=pltpu.MemorySpace.SMEM),       # bias (1,)
            ],
            out_specs=pl.BlockSpec((TB, 1), lambda i, c: (i, 0)),        # resident over c
            scratch_shapes=[pltpu.VMEM((TB, S), jnp.float32)],           # scores accumulator
        ),
        compiler_params=pltpu.CompilerParams(
            dimension_semantics=("parallel", "arbitrary"),
            vmem_limit_bytes=vmem_limit,
        ),
    )(x, w, bvec)
    return out[:B]


def plain_head_reference(x_nchw, weight, bias, topk_rate=0.1):
    """Pure-JAX reference matching the PyTorch forward."""
    B, C, H, W = x_nchw.shape
    s = jnp.einsum("bchw,c->bhw", x_nchw.astype(jnp.float32),
                   weight.reshape(-1).astype(jnp.float32))
    s = s + bias.reshape(()).astype(jnp.float32)
    s = s.reshape(B, -1)
    k = max(int(s.shape[1] * topk_rate), 1)
    topk_vals = lax.top_k(jnp.abs(s), k)[0]
    return jnp.mean(topk_vals, axis=1).reshape(-1, 1)


if __name__ == "__main__":
    key = jax.random.PRNGKey(0)
    kx, kw, kb = jax.random.split(key, 3)

    B, C, H, W = 2, 4, 16, 16
    x = jax.random.normal(kx, (B, C, H, W), dtype=jnp.float32)
    # Conv2d(in_dim, 1, kernel_size=1) parameters: weight (1, C, 1, 1), bias (1,)
    weight = jax.random.normal(kw, (1, C, 1, 1), dtype=jnp.float32) * 0.1
    bias = jax.random.normal(kb, (1,), dtype=jnp.float32) * 0.1

    out = plain_head(x, weight, bias, topk_rate=0.1)
    out = jax.block_until_ready(out)

    ref = plain_head_reference(x, weight, bias, topk_rate=0.1)
    assert out.shape == (B, 1), out.shape
    assert jnp.allclose(out, ref, atol=1e-5, rtol=1e-5), (out, ref)

    print("KERNEL_OK")
</pallas_src>

<mosaic_0001>
module attributes {stable_mosaic.version = 11 : i64} {
  func.func @_plain_head_kernel(%arg0: i32, %arg1: i32, %arg2: memref<2x4x256xf32, #tpu.memory_space<vmem>>, %arg3: memref<1x4x1xf32, #tpu.memory_space<vmem>>, %arg4: memref<1xf32, #tpu.memory_space<smem>>, %arg5: memref<2x1xf32, #tpu.memory_space<vmem>>, %arg6: memref<2x256xf32, #tpu.memory_space<vmem>>) attributes {dimension_semantics = [#tpu.dimension_semantics<parallel>, #tpu.dimension_semantics<arbitrary>], iteration_bounds = array<i64: 1, 1>, scalar_prefetch = 0 : i64, scratch_operands = 1 : i64, tpu.core_type = #tpu.core_type<tc>, window_params = [{transform_indices = @transform_0, window_bounds = array<i64: 2, 4, 256>}, {transform_indices = @transform_1, window_bounds = array<i64: 1, 4, 1>}, {transform_indices = @transform_2, window_bounds = array<i64: 1>}, {transform_indices = @transform_3, window_bounds = array<i64: 2, 1>}]} {
    %c0_i32 = arith.constant 0 : i32
    %0 = arith.cmpi eq, %arg1, %c0_i32 : i32
    %1 = arith.extui %0 : i1 to i32
    %c0_i32_0 = arith.constant 0 : i32
    %2 = arith.cmpi ne, %1, %c0_i32_0 : i32
    scf.if %2 {
      %cst_12 = arith.constant 0.000000e+00 : f32
      %14 = vector.broadcast %cst_12 : f32 to vector<2x256xf32>
      %c0_13 = arith.constant 0 : index
      %c0_14 = arith.constant 0 : index
      %15 = vector.load %arg6[%c0_13, %c0_14] : memref<2x256xf32, #tpu.memory_space<vmem>>, vector<2x256xf32>
      tpu.vector_store %arg6[%c0_13, %c0_14], %14 {strides = array<i32>} : memref<2x256xf32, #tpu.memory_space<vmem>>, vector<2x256xf32>,
    } else {
    }
    %c0 = arith.constant 0 : index
    %c0_1 = arith.constant 0 : index
    %c0_2 = arith.constant 0 : index
    %3 = vector.load %arg2[%c0, %c0_1, %c0_2] : memref<2x4x256xf32, #tpu.memory_space<vmem>>, vector<2x4x256xf32>
    %c0_3 = arith.constant 0 : index
    %c0_4 = arith.constant 0 : index
    %4 = vector.load %arg6[%c0_3, %c0_4] : memref<2x256xf32, #tpu.memory_space<vmem>>, vector<2x256xf32>
    %c0_5 = arith.constant 0 : index
    %c0_6 = arith.constant 0 : index
    %c0_7 = arith.constant 0 : index
    %5 = vector.load %arg3[%c0_5, %c0_6, %c0_7] : memref<1x4x1xf32, #tpu.memory_space<vmem>>, vector<1x4x1xf32>
    %6 = vector.broadcast %5 : vector<1x4x1xf32> to vector<2x4x256xf32>
    %7 = arith.mulf %3, %6 : vector<2x4x256xf32>
    %cst = arith.constant dense<0.000000e+00> : vector<2x256xf32>
    %8 = vector.multi_reduction <add>, %7, %cst [1] : vector<2x4x256xf32> to vector<2x256xf32>
    %9 = arith.addf %4, %8 : vector<2x256xf32>
    %c0_8 = arith.constant 0 : index
    %c0_9 = arith.constant 0 : index
    %10 = vector.load %arg6[%c0_8, %c0_9] : memref<2x256xf32, #tpu.memory_space<vmem>>, vector<2x256xf32>
    tpu.vector_store %arg6[%c0_8, %c0_9], %9 {strides = array<i32>} : memref<2x256xf32, #tpu.memory_space<vmem>>, vector<2x256xf32>,
    %c0_i32_10 = arith.constant 0 : i32
    %11 = arith.cmpi eq, %arg1, %c0_i32_10 : i32
    %12 = arith.extui %11 : i1 to i32
    %c0_i32_11 = arith.constant 0 : i32
    %13 = arith.cmpi ne, %12, %c0_i32_11 : i32
    scf.if %13 {
      %c0_12 = arith.constant 0 : index
      %c0_13 = arith.constant 0 : index
      %14 = vector.load %arg6[%c0_12, %c0_13] : memref<2x256xf32, #tpu.memory_space<vmem>>, vector<2x256xf32>
      %c0_14 = arith.constant 0 : index
      %15 = memref.load %arg4[%c0_14] : memref<1xf32, #tpu.memory_space<smem>>
      %16 = vector.broadcast %15 : f32 to vector<2x256xf32>
      %17 = arith.addf %14, %16 : vector<2x256xf32>
      %18 = math.absf %17 : vector<2x256xf32>
      %19 = tpu.bitcast %18 : vector<2x256xf32> -> vector<2x256xi32>
      %c0_i32_15 = arith.constant 0 : i32
      %20 = vector.broadcast %c0_i32_15 : i32 to vector<2x1xi32>
      %c2139095040_i32 = arith.constant 2139095040 : i32
      %21 = vector.broadcast %c2139095040_i32 : i32 to vector<2x1xi32>
      %cst_16 = arith.constant 2.500000e+01 : f32
      %c0_i32_17 = arith.constant 0 : i32
      %22 = arith.subi %21, %20 : vector<2x1xi32>
      %c1_i32 = arith.constant 1 : i32
      %23 = vector.broadcast %c1_i32 : i32 to vector<2x1xi32>
      %24 = arith.addi %22, %23 : vector<2x1xi32>
      %c1_i32_18 = arith.constant 1 : i32
      %25 = vector.broadcast %c1_i32_18 : i32 to vector<2x1xi32>
      %26 = arith.shrsi %24, %25 : vector<2x1xi32>
      %27 = arith.addi %20, %26 : vector<2x1xi32>
      %28 = vector.broadcast %27 : vector<2x1xi32> to vector<2x256xi32>
      %29 = arith.cmpi sge, %19, %28 : vector<2x256xi32>
      %30 = arith.extui %29 : vector<2x256xi1> to vector<2x256xi32>
      %31 = arith.sitofp %30 : vector<2x256xi32> to vector<2x256xf32>
      %cst_19 = arith.constant dense<0.000000e+00> : vector<2xf32>
      %32 = vector.multi_reduction <add>, %31, %cst_19 [1] : vector<2x256xf32> to vector<2xf32>
      %33 = vector.shape_cast %32 : vector<2xf32> to vector<2x1xf32>
      %34 = vector.broadcast %cst_16 : f32 to vector<2x1xf32>
      %35 = arith.cmpf oge, %33, %34 : vector<2x1xf32>
      %36 = arith.select %35, %27, %20 : vector<2x1xi1>, vector<2x1xi32>
      %c1_i32_20 = arith.constant 1 : i32
      %37 = vector.broadcast %c1_i32_20 : i32 to vector<2x1xi32>
      %38 = arith.subi %27, %37 : vector<2x1xi32>
      %39 = arith.select %35, %21, %38 : vector<2x1xi1>, vector<2x1xi32>
      %c1_i32_21 = arith.constant 1 : i32
      %40 = arith.subi %39, %36 : vector<2x1xi32>
      %c1_i32_22 = arith.constant 1 : i32
      %41 = vector.broadcast %c1_i32_22 : i32 to vector<2x1xi32>
      %42 = arith.addi %40, %41 : vector<2x1xi32>
      %c1_i32_23 = arith.constant 1 : i32
      %43 = vector.broadcast %c1_i32_23 : i32 to vector<2x1xi32>
      %44 = arith.shrsi %42, %43 : vector<2x1xi32>
      %45 = arith.addi %36, %44 : vector<2x1xi32>
      %46 = vector.broadcast %45 : vector<2x1xi32> to vector<2x256xi32>
      %47 = arith.cmpi sge, %19, %46 : vector<2x256xi32>
      %48 = arith.extui %47 : vector<2x256xi1> to vector<2x256xi32>
      %49 = arith.sitofp %48 : vector<2x256xi32> to vector<2x256xf32>
      %cst_24 = arith.constant dense<0.000000e+00> : vector<2xf32>
      %50 = vector.multi_reduction <add>, %49, %cst_24 [1] : vector<2x256xf32> to vector<2xf32>
      %51 = vector.shape_cast %50 : vector<2xf32> to vector<2x1xf32>
      %52 = vector.broadcast %cst_16 : f32 to vector<2x1xf32>
      %53 = arith.cmpf oge, %51, %52 : vector<2x1xf32>
      %54 = arith.select %53, %45, %36 : vector<2x1xi1>, vector<2x1xi32>
      %c1_i32_25 = arith.constant 1 : i32
      %55 = vector.broadcast %c1_i32_25 : i32 to vector<2x1xi32>
      %56 = arith.subi %45, %55 : vector<2x1xi32>
      %57 = arith.select %53, %39, %56 : vector<2x1xi1>, vector<2x1xi32>
      %c2_i32 = arith.constant 2 : i32
      %58 = arith.subi %57, %54 : vector<2x1xi32>
      %c1_i32_26 = arith.constant 1 : i32
      %59 = vector.broadcast %c1_i32_26 : i32 to vector<2x1xi32>
      %60 = arith.addi %58, %59 : vector<2x1xi32>
      %c1_i32_27 = arith.constant 1 : i32
      %61 = vector.broadcast %c1_i32_27 : i32 to vector<2x1xi32>
      %62 = arith.shrsi %60, %61 : vector<2x1xi32>
      %63 = arith.addi %54, %62 : vector<2x1xi32>
      %64 = vector.broadcast %63 : vector<2x1xi32> to vector<2x256xi32>
      %65 = arith.cmpi sge, %19, %64 : vector<2x256xi32>
      %66 = arith.extui %65 : vector<2x256xi1> to vector<2x256xi32>
      %67 = arith.sitofp %66 : vector<2x256xi32> to vector<2x256xf32>
      %cst_28 = arith.constant dense<0.000000e+00> : vector<2xf32>
      %68 = vector.multi_reduction <add>, %67, %cst_28 [1] : vector<2x256xf32> to vector<2xf32>
      %69 = vector.shape_cast %68 : vector<2xf32> to vector<2x1xf32>
      %70 = vector.broadcast %cst_16 : f32 to vector<2x1xf32>
      %71 = arith.cmpf oge, %69, %70 : vector<2x1xf32>
      %72 = arith.select %71, %63, %54 : vector<2x1xi1>, vector<2x1xi32>
      %c1_i32_29 = arith.constant 1 : i32
      %73 = vector.broadcast %c1_i32_29 : i32 to vector<2x1xi32>
      %74 = arith.subi %63, %73 : vector<2x1xi32>
      %75 = arith.select %71, %57, %74 : vector<2x1xi1>, vector<2x1xi32>
      %c3_i32 = arith.constant 3 : i32
      %76 = arith.subi %75, %72 : vector<2x1xi32>
      %c1_i32_30 = arith.constant 1 : i32
      %77 = vector.broadcast %c1_i32_30 : i32 to vector<2x1xi32>
      %78 = arith.addi %76, %77 : vector<2x1xi32>
      %c1_i32_31 = arith.constant 1 : i32
      %79 = vector.broadcast %c1_i32_31 : i32 to vector<2x1xi32>
      %80 = arith.shrsi %78, %79 : vector<2x1xi32>
      %81 = arith.addi %72, %80 : vector<2x1xi32>
      %82 = vector.broadcast %81 : vector<2x1xi32> to vector<2x256xi32>
      %83 = arith.cmpi sge, %19, %82 : vector<2x256xi32>
      %84 = arith.extui %83 : vector<2x256xi1> to vector<2x256xi32>
      %85 = arith.sitofp %84 : vector<2x256xi32> to vector<2x256xf32>
      %cst_32 = arith.constant dense<0.000000e+00> : vector<2xf32>
      %86 = vector.multi_reduction <add>, %85, %cst_32 [1] : vector<2x256xf32> to vector<2xf32>
      %87 = vector.shape_cast %86 : vector<2xf32> to vector<2x1xf32>
      %88 = vector.broadcast %cst_16 : f32 to vector<2x1xf32>
      %89 = arith.cmpf oge, %87, %88 : vector<2x1xf32>
      %90 = arith.select %89, %81, %72 : vector<2x1xi1>, vector<2x1xi32>
      %c1_i32_33 = arith.constant 1 : i32
      %91 = vector.broadcast %c1_i32_33 : i32 to vector<2x1xi32>
      %92 = arith.subi %81, %91 : vector<2x1xi32>
      %93 = arith.select %89, %75, %92 : vector<2x1xi1>, vector<2x1xi32>
      %c4_i32 = arith.constant 4 : i32
      %94 = arith.subi %93, %90 : vector<2x1xi32>
      %c1_i32_34 = arith.constant 1 : i32
      %95 = vector.broadcast %c1_i32_34 : i32 to vector<2x1xi32>
      %96 = arith.addi %94, %95 : vector<2x1xi32>
      %c1_i32_35 = arith.constant 1 : i32
      %97 = vector.broadcast %c1_i32_35 : i32 to vector<2x1xi32>
      %98 = arith.shrsi %96, %97 : vector<2x1xi32>
      %99 = arith.addi %90, %98 : vector<2x1xi32>
      %100 = vector.broadcast %99 : vector<2x1xi32> to vector<2x256xi32>
      %101 = arith.cmpi sge, %19, %100 : vector<2x256xi32>
      %102 = arith.extui %101 : vector<2x256xi1> to vector<2x256xi32>
      %103 = arith.sitofp %102 : vector<2x256xi32> to vector<2x256xf32>
      %cst_36 = arith.constant dense<0.000000e+00> : vector<2xf32>
      %104 = vector.multi_reduction <add>, %103, %cst_36 [1] : vector<2x256xf32> to vector<2xf32>
      %105 = vector.shape_cast %104 : vector<2xf32> to vector<2x1xf32>
      %106 = vector.broadcast %cst_16 : f32 to vector<2x1xf32>
      %107 = arith.cmpf oge, %105, %106 : vector<2x1xf32>
      %108 = arith.select %107, %99, %90 : vector<2x1xi1>, vector<2x1xi32>
      %c1_i32_37 = arith.constant 1 : i32
      %109 = vector.broadcast %c1_i32_37 : i32 to vector<2x1xi32>
      %110 = arith.subi %99, %109 : vector<2x1xi32>
      %111 = arith.select %107, %93, %110 : vector<2x1xi1>, vector<2x1xi32>
      %c5_i32 = arith.constant 5 : i32
      %112 = arith.subi %111, %108 : vector<2x1xi32>
      %c1_i32_38 = arith.constant 1 : i32
      %113 = vector.broadcast %c1_i32_38 : i32 to vector<2x1xi32>
      %114 = arith.addi %112, %113 : vector<2x1xi32>
      %c1_i32_39 = arith.constant 1 : i32
      %115 = vector.broadcast %c1_i32_39 : i32 to vector<2x1xi32>
      %116 = arith.shrsi %114, %115 : vector<2x1xi32>
      %117 = arith.addi %108, %116 : vector<2x1xi32>
      %118 = vector.broadcast %117 : vector<2x1xi32> to vector<2x256xi32>
      %119 = arith.cmpi sge, %19, %118 : vector<2x256xi32>
      %120 = arith.extui %119 : vector<2x256xi1> to vector<2x256xi32>
      %121 = arith.sitofp %120 : vector<2x256xi32> to vector<2x256xf32>
      %cst_40 = arith.constant dense<0.000000e+00> : vector<2xf32>
      %122 = vector.multi_reduction <add>, %121, %cst_40 [1] : vector<2x256xf32> to vector<2xf32>
      %123 = vector.shape_cast %122 : vector<2xf32> to vector<2x1xf32>
      %124 = vector.broadcast %cst_16 : f32 to vector<2x1xf32>
      %125 = arith.cmpf oge, %123, %124 : vector<2x1xf32>
      %126 = arith.select %125, %117, %108 : vector<2x1xi1>, vector<2x1xi32>
      %c1_i32_41 = arith.constant 1 : i32
      %127 = vector.broadcast %c1_i32_41 : i32 to vector<2x1xi32>
      %128 = arith.subi %117, %127 : vector<2x1xi32>
      %129 = arith.select %125, %111, %128 : vector<2x1xi1>, vector<2x1xi32>
      %c6_i32 = arith.constant 6 : i32
      %130 = arith.subi %129, %126 : vector<2x1xi32>
      %c1_i32_42 = arith.constant 1 : i32
      %131 = vector.broadcast %c1_i32_42 : i32 to vector<2x1xi32>
      %132 = arith.addi %130, %131 : vector<2x1xi32>
      %c1_i32_43 = arith.constant 1 : i32
      %133 = vector.broadcast %c1_i32_43 : i32 to vector<2x1xi32>
      %134 = arith.shrsi %132, %133 : vector<2x1xi32>
      %135 = arith.addi %126, %134 : vector<2x1xi32>
      %136 = vector.broadcast %135 : vector<2x1xi32> to vector<2x256xi32>
      %137 = arith.cmpi sge, %19, %136 : vector<2x256xi32>
      %138 = arith.extui %137 : vector<2x256xi1> to vector<2x256xi32>
      %139 = arith.sitofp %138 : vector<2x256xi32> to vector<2x256xf32>
      %cst_44 = arith.constant dense<0.000000e+00> : vector<2xf32>
      %140 = vector.multi_reduction <add>, %139, %cst_44 [1] : vector<2x256xf32> to vector<2xf32>
      %141 = vector.shape_cast %140 : vector<2xf32> to vector<2x1xf32>
      %142 = vector.broadcast %cst_16 : f32 to vector<2x1xf32>
      %143 = arith.cmpf oge, %141, %142 : vector<2x1xf32>
      %144 = arith.select %143, %135, %126 : vector<2x1xi1>, vector<2x1xi32>
      %c1_i32_45 = arith.constant 1 : i32
      %145 = vector.broadcast %c1_i32_45 : i32 to vector<2x1xi32>
      %146 = arith.subi %135, %145 : vector<2x1xi32>
      %147 = arith.select %143, %129, %146 : vector<2x1xi1>, vector<2x1xi32>
      %c7_i32 = arith.constant 7 : i32
      %148 = arith.subi %147, %144 : vector<2x1xi32>
      %c1_i32_46 = arith.constant 1 : i32
      %149 = vector.broadcast %c1_i32_46 : i32 to vector<2x1xi32>
      %150 = arith.addi %148, %149 : vector<2x1xi32>
      %c1_i32_47 = arith.constant 1 : i32
      %151 = vector.broadcast %c1_i32_47 : i32 to vector<2x1xi32>
      %152 = arith.shrsi %150, %151 : vector<2x1xi32>
      %153 = arith.addi %144, %152 : vector<2x1xi32>
      %154 = vector.broadcast %153 : vector<2x1xi32> to vector<2x256xi32>
      %155 = arith.cmpi sge, %19, %154 : vector<2x256xi32>
      %156 = arith.extui %155 : vector<2x256xi1> to vector<2x256xi32>
      %157 = arith.sitofp %156 : vector<2x256xi32> to vector<2x256xf32>
      %cst_48 = arith.constant dense<0.000000e+00> : vector<2xf32>
      %158 = vector.multi_reduction <add>, %157, %cst_48 [1] : vector<2x256xf32> to vector<2xf32>
      %159 = vector.shape_cast %158 : vector<2xf32> to vector<2x1xf32>
      %160 = vector.broadcast %cst_16 : f32 to vector<2x1xf32>
      %161 = arith.cmpf oge, %159, %160 : vector<2x1xf32>
      %162 = arith.select %161, %153, %144 : vector<2x1xi1>, vector<2x1xi32>
      %c1_i32_49 = arith.constant 1 : i32
      %163 = vector.broadcast %c1_i32_49 : i32 to vector<2x1xi32>
      %164 = arith.subi %153, %163 : vector<2x1xi32>
      %165 = arith.select %161, %147, %164 : vector<2x1xi1>, vector<2x1xi32>
      %c8_i32 = arith.constant 8 : i32
      %166 = arith.subi %165, %162 : vector<2x1xi32>
      %c1_i32_50 = arith.constant 1 : i32
      %167 = vector.broadcast %c1_i32_50 : i32 to vector<2x1xi32>
      %168 = arith.addi %166, %167 : vector<2x1xi32>
      %c1_i32_51 = arith.constant 1 : i32
      %169 = vector.broadcast %c1_i32_51 : i32 to vector<2x1xi32>
      %170 = arith.shrsi %168, %169 : vector<2x1xi32>
      %171 = arith.addi %162, %170 : vector<2x1xi32>
      %172 = vector.broadcast %171 : vector<2x1xi32> to vector<2x256xi32>
      %173 = arith.cmpi sge, %19, %172 : vector<2x256xi32>
      %174 = arith.extui %173 : vector<2x256xi1> to vector<2x256xi32>
      %175 = arith.sitofp %174 : vector<2x256xi32> to vector<2x256xf32>
      %cst_52 = arith.constant dense<0.000000e+00> : vector<2xf32>
      %176 = vector.multi_reduction <add>, %175, %cst_52 [1] : vector<2x256xf32> to vector<2xf32>
      %177 = vector.shape_cast %176 : vector<2xf32> to vector<2x1xf32>
      %178 = vector.broadcast %cst_16 : f32 to vector<2x1xf32>
      %179 = arith.cmpf oge, %177, %178 : vector<2x1xf32>
      %180 = arith.select %179, %171, %162 : vector<2x1xi1>, vector<2x1xi32>
      %c1_i32_53 = arith.constant 1 : i32
      %181 = vector.broadcast %c1_i32_53 : i32 to vector<2x1xi32>
      %182 = arith.subi %171, %181 : vector<2x1xi32>
      %183 = arith.select %179, %165, %182 : vector<2x1xi1>, vector<2x1xi32>
      %c9_i32 = arith.constant 9 : i32
      %184 = arith.subi %183, %180 : vector<2x1xi32>
      %c1_i32_54 = arith.constant 1 : i32
      %185 = vector.broadcast %c1_i32_54 : i32 to vector<2x1xi32>
      %186 = arith.addi %184, %185 : vector<2x1xi32>
      %c1_i32_55 = arith.constant 1 : i32
      %187 = vector.broadcast %c1_i32_55 : i32 to vector<2x1xi32>
      %188 = arith.shrsi %186, %187 : vector<2x1xi32>
      %189 = arith.addi %180, %188 : vector<2x1xi32>
      %190 = vector.broadcast %189 : vector<2x1xi32> to vector<2x256xi32>
      %191 = arith.cmpi sge, %19, %190 : vector<2x256xi32>
      %192 = arith.extui %191 : vector<2x256xi1> to vector<2x256xi32>
      %193 = arith.sitofp %192 : vector<2x256xi32> to vector<2x256xf32>
      %cst_56 = arith.constant dense<0.000000e+00> : vector<2xf32>
      %194 = vector.multi_reduction <add>, %193, %cst_56 [1] : vector<2x256xf32> to vector<2xf32>
      %195 = vector.shape_cast %194 : vector<2xf32> to vector<2x1xf32>
      %196 = vector.broadcast %cst_16 : f32 to vector<2x1xf32>
      %197 = arith.cmpf oge, %195, %196 : vector<2x1xf32>
      %198 = arith.select %197, %189, %180 : vector<2x1xi1>, vector<2x1xi32>
      %c1_i32_57 = arith.constant 1 : i32
      %199 = vector.broadcast %c1_i32_57 : i32 to vector<2x1xi32>
      %200 = arith.subi %189, %199 : vector<2x1xi32>
      %201 = arith.select %197, %183, %200 : vector<2x1xi1>, vector<2x1xi32>
      %c10_i32 = arith.constant 10 : i32
      %202 = arith.subi %201, %198 : vector<2x1xi32>
      %c1_i32_58 = arith.constant 1 : i32
      %203 = vector.broadcast %c1_i32_58 : i32 to vector<2x1xi32>
      %204 = arith.addi %202, %203 : vector<2x1xi32>
      %c1_i32_59 = arith.constant 1 : i32
      %205 = vector.broadcast %c1_i32_59 : i32 to vector<2x1xi32>
      %206 = arith.shrsi %204, %205 : vector<2x1xi32>
      %207 = arith.addi %198, %206 : vector<2x1xi32>
      %208 = vector.broadcast %207 : vector<2x1xi32> to vector<2x256xi32>
      %209 = arith.cmpi sge, %19, %208 : vector<2x256xi32>
      %210 = arith.extui %209 : vector<2x256xi1> to vector<2x256xi32>
      %211 = arith.sitofp %210 : vector<2x256xi32> to vector<2x256xf32>
      %cst_60 = arith.constant dense<0.000000e+00> : vector<2xf32>
      %212 = vector.multi_reduction <add>, %211, %cst_60 [1] : vector<2x256xf32> to vector<2xf32>
      %213 = vector.shape_cast %212 : vector<2xf32> to vector<2x1xf32>
      %214 = vector.broadcast %cst_16 : f32 to vector<2x1xf32>
      %215 = arith.cmpf oge, %213, %214 : vector<2x1xf32>
      %216 = arith.select %215, %207, %198 : vector<2x1xi1>, vector<2x1xi32>
      %c1_i32_61 = arith.constant 1 : i32
      %217 = vector.broadcast %c1_i32_61 : i32 to vector<2x1xi32>
      %218 = arith.subi %207, %217 : vector<2x1xi32>
      %219 = arith.select %215, %201, %218 : vector<2x1xi1>, vector<2x1xi32>
      %c11_i32 = arith.constant 11 : i32
      %220 = arith.subi %219, %216 : vector<2x1xi32>
      %c1_i32_62 = arith.constant 1 : i32
      %221 = vector.broadcast %c1_i32_62 : i32 to vector<2x1xi32>
      %222 = arith.addi %220, %221 : vector<2x1xi32>
      %c1_i32_63 = arith.constant 1 : i32
      %223 = vector.broadcast %c1_i32_63 : i32 to vector<2x1xi32>
      %224 = arith.shrsi %222, %223 : vector<2x1xi32>
      %225 = arith.addi %216, %224 : vector<2x1xi32>
      %226 = vector.broadcast %225 : vector<2x1xi32> to vector<2x256xi32>
      %227 = arith.cmpi sge, %19, %226 : vector<2x256xi32>
      %228 = arith.extui %227 : vector<2x256xi1> to vector<2x256xi32>
      %229 = arith.sitofp %228 : vector<2x256xi32> to vector<2x256xf32>
      %cst_64 = arith.constant dense<0.000000e+00> : vector<2xf32>
      %230 = vector.multi_reduction <add>, %229, %cst_64 [1] : vector<2x256xf32> to vector<2xf32>
      %231 = vector.shape_cast %230 : vector<2xf32> to vector<2x1xf32>
      %232 = vector.broadcast %cst_16 : f32 to vector<2x1xf32>
      %233 = arith.cmpf oge, %231, %232 : vector<2x1xf32>
      %234 = arith.select %233, %225, %216 : vector<2x1xi1>, vector<2x1xi32>
      %c1_i32_65 = arith.constant 1 : i32
      %235 = vector.broadcast %c1_i32_65 : i32 to vector<2x1xi32>
      %236 = arith.subi %225, %235 : vector<2x1xi32>
      %237 = arith.select %233, %219, %236 : vector<2x1xi1>, vector<2x1xi32>
      %c12_i32 = arith.constant 12 : i32
      %238 = arith.subi %237, %234 : vector<2x1xi32>
      %c1_i32_66 = arith.constant 1 : i32
      %239 = vector.broadcast %c1_i32_66 : i32 to vector<2x1xi32>
      %240 = arith.addi %238, %239 : vector<2x1xi32>
      %c1_i32_67 = arith.constant 1 : i32
      %241 = vector.broadcast %c1_i32_67 : i32 to vector<2x1xi32>
      %242 = arith.shrsi %240, %241 : vector<2x1xi32>
      %243 = arith.addi %234, %242 : vector<2x1xi32>
      %244 = vector.broadcast %243 : vector<2x1xi32> to vector<2x256xi32>
      %245 = arith.cmpi sge, %19, %244 : vector<2x256xi32>
      %246 = arith.extui %245 : vector<2x256xi1> to vector<2x256xi32>
      %247 = arith.sitofp %246 : vector<2x256xi32> to vector<2x256xf32>
      %cst_68 = arith.constant dense<0.000000e+00> : vector<2xf32>
      %248 = vector.multi_reduction <add>, %247, %cst_68 [1] : vector<2x256xf32> to vector<2xf32>
      %249 = vector.shape_cast %248 : vector<2xf32> to vector<2x1xf32>
      %250 = vector.broadcast %cst_16 : f32 to vector<2x1xf32>
      %251 = arith.cmpf oge, %249, %250 : vector<2x1xf32>
      %252 = arith.select %251, %243, %234 : vector<2x1xi1>, vector<2x1xi32>
      %c1_i32_69 = arith.constant 1 : i32
      %253 = vector.broadcast %c1_i32_69 : i32 to vector<2x1xi32>
      %254 = arith.subi %243, %253 : vector<2x1xi32>
      %255 = arith.select %251, %237, %254 : vector<2x1xi1>, vector<2x1xi32>
      %c13_i32 = arith.constant 13 : i32
      %256 = arith.subi %255, %252 : vector<2x1xi32>
      %c1_i32_70 = arith.constant 1 : i32
      %257 = vector.broadcast %c1_i32_70 : i32 to vector<2x1xi32>
      %258 = arith.addi %256, %257 : vector<2x1xi32>
      %c1_i32_71 = arith.constant 1 : i32
      %259 = vector.broadcast %c1_i32_71 : i32 to vector<2x1xi32>
      %260 = arith.shrsi %258, %259 : vector<2x1xi32>
      %261 = arith.addi %252, %260 : vector<2x1xi32>
      %262 = vector.broadcast %261 : vector<2x1xi32> to vector<2x256xi32>
      %263 = arith.cmpi sge, %19, %262 : vector<2x256xi32>
      %264 = arith.extui %263 : vector<2x256xi1> to vector<2x256xi32>
      %265 = arith.sitofp %264 : vector<2x256xi32> to vector<2x256xf32>
      %cst_72 = arith.constant dense<0.000000e+00> : vector<2xf32>
      %266 = vector.multi_reduction <add>, %265, %cst_72 [1] : vector<2x256xf32> to vector<2xf32>
      %267 = vector.shape_cast %266 : vector<2xf32> to vector<2x1xf32>
      %268 = vector.broadcast %cst_16 : f32 to vector<2x1xf32>
      %269 = arith.cmpf oge, %267, %268 : vector<2x1xf32>
      %270 = arith.select %269, %261, %252 : vector<2x1xi1>, vector<2x1xi32>
      %c1_i32_73 = arith.constant 1 : i32
      %271 = vector.broadcast %c1_i32_73 : i32 to vector<2x1xi32>
      %272 = arith.subi %261, %271 : vector<2x1xi32>
      %273 = arith.select %269, %255, %272 : vector<2x1xi1>, vector<2x1xi32>
      %c14_i32 = arith.constant 14 : i32
      %274 = arith.subi %273, %270 : vector<2x1xi32>
      %c1_i32_74 = arith.constant 1 : i32
      %275 = vector.broadcast %c1_i32_74 : i32 to vector<2x1xi32>
      %276 = arith.addi %274, %275 : vector<2x1xi32>
      %c1_i32_75 = arith.constant 1 : i32
      %277 = vector.broadcast %c1_i32_75 : i32 to vector<2x1xi32>
      %278 = arith.shrsi %276, %277 : vector<2x1xi32>
      %279 = arith.addi %270, %278 : vector<2x1xi32>
      %280 = vector.broadcast %279 : vector<2x1xi32> to vector<2x256xi32>
      %281 = arith.cmpi sge, %19, %280 : vector<2x256xi32>
      %282 = arith.extui %281 : vector<2x256xi1> to vector<2x256xi32>
      %283 = arith.sitofp %282 : vector<2x256xi32> to vector<2x256xf32>
      %cst_76 = arith.constant dense<0.000000e+00> : vector<2xf32>
      %284 = vector.multi_reduction <add>, %283, %cst_76 [1] : vector<2x256xf32> to vector<2xf32>
      %285 = vector.shape_cast %284 : vector<2xf32> to vector<2x1xf32>
      %286 = vector.broadcast %cst_16 : f32 to vector<2x1xf32>
      %287 = arith.cmpf oge, %285, %286 : vector<2x1xf32>
      %288 = arith.select %287, %279, %270 : vector<2x1xi1>, vector<2x1xi32>
      %c1_i32_77 = arith.constant 1 : i32
      %289 = vector.broadcast %c1_i32_77 : i32 to vector<2x1xi32>
      %290 = arith.subi %279, %289 : vector<2x1xi32>
      %291 = arith.select %287, %273, %290 : vector<2x1xi1>, vector<2x1xi32>
      %c15_i32 = arith.constant 15 : i32
      %292 = arith.subi %291, %288 : vector<2x1xi32>
      %c1_i32_78 = arith.constant 1 : i32
      %293 = vector.broadcast %c1_i32_78 : i32 to vector<2x1xi32>
      %294 = arith.addi %292, %293 : vector<2x1xi32>
      %c1_i32_79 = arith.constant 1 : i32
      %295 = vector.broadcast %c1_i32_79 : i32 to vector<2x1xi32>
      %296 = arith.shrsi %294, %295 : vector<2x1xi32>
      %297 = arith.addi %288, %296 : vector<2x1xi32>
      %298 = vector.broadcast %297 : vector<2x1xi32> to vector<2x256xi32>
      %299 = arith.cmpi sge, %19, %298 : vector<2x256xi32>
      %300 = arith.extui %299 : vector<2x256xi1> to vector<2x256xi32>
      %301 = arith.sitofp %300 : vector<2x256xi32> to vector<2x256xf32>
      %cst_80 = arith.constant dense<0.000000e+00> : vector<2xf32>
      %302 = vector.multi_reduction <add>, %301, %cst_80 [1] : vector<2x256xf32> to vector<2xf32>
      %303 = vector.shape_cast %302 : vector<2xf32> to vector<2x1xf32>
      %304 = vector.broadcast %cst_16 : f32 to vector<2x1xf32>
      %305 = arith.cmpf oge, %303, %304 : vector<2x1xf32>
      %306 = arith.select %305, %297, %288 : vector<2x1xi1>, vector<2x1xi32>
      %c1_i32_81 = arith.constant 1 : i32
      %307 = vector.broadcast %c1_i32_81 : i32 to vector<2x1xi32>
      %308 = arith.subi %297, %307 : vector<2x1xi32>
      %309 = arith.select %305, %291, %308 : vector<2x1xi1>, vector<2x1xi32>
      %c16_i32 = arith.constant 16 : i32
      %310 = arith.subi %309, %306 : vector<2x1xi32>
      %c1_i32_82 = arith.constant 1 : i32
      %311 = vector.broadcast %c1_i32_82 : i32 to vector<2x1xi32>
      %312 = arith.addi %310, %311 : vector<2x1xi32>
      %c1_i32_83 = arith.constant 1 : i32
      %313 = vector.broadcast %c1_i32_83 : i32 to vector<2x1xi32>
      %314 = arith.shrsi %312, %313 : vector<2x1xi32>
      %315 = arith.addi %306, %314 : vector<2x1xi32>
      %316 = vector.broadcast %315 : vector<2x1xi32> to vector<2x256xi32>
      %317 = arith.cmpi sge, %19, %316 : vector<2x256xi32>
      %318 = arith.extui %317 : vector<2x256xi1> to vector<2x256xi32>
      %319 = arith.sitofp %318 : vector<2x256xi32> to vector<2x256xf32>
      %cst_84 = arith.constant dense<0.000000e+00> : vector<2xf32>
      %320 = vector.multi_reduction <add>, %319, %cst_84 [1] : vector<2x256xf32> to vector<2xf32>
      %321 = vector.shape_cast %320 : vector<2xf32> to vector<2x1xf32>
      %322 = vector.broadcast %cst_16 : f32 to vector<2x1xf32>
      %323 = arith.cmpf oge, %321, %322 : vector<2x1xf32>
      %324 = arith.select %323, %315, %306 : vector<2x1xi1>, vector<2x1xi32>
      %c1_i32_85 = arith.constant 1 : i32
      %325 = vector.broadcast %c1_i32_85 : i32 to vector<2x1xi32>
      %326 = arith.subi %315, %325 : vector<2x1xi32>
      %327 = arith.select %323, %309, %326 : vector<2x1xi1>, vector<2x1xi32>
      %c17_i32 = arith.constant 17 : i32
      %328 = arith.subi %327, %324 : vector<2x1xi32>
      %c1_i32_86 = arith.constant 1 : i32
      %329 = vector.broadcast %c1_i32_86 : i32 to vector<2x1xi32>
      %330 = arith.addi %328, %329 : vector<2x1xi32>
      %c1_i32_87 = arith.constant 1 : i32
      %331 = vector.broadcast %c1_i32_87 : i32 to vector<2x1xi32>
      %332 = arith.shrsi %330, %331 : vector<2x1xi32>
      %333 = arith.addi %324, %332 : vector<2x1xi32>
      %334 = vector.broadcast %333 : vector<2x1xi32> to vector<2x256xi32>
      %335 = arith.cmpi sge, %19, %334 : vector<2x256xi32>
      %336 = arith.extui %335 : vector<2x256xi1> to vector<2x256xi32>
      %337 = arith.sitofp %336 : vector<2x256xi32> to vector<2x256xf32>
      %cst_88 = arith.constant dense<0.000000e+00> : vector<2xf32>
      %338 = vector.multi_reduction <add>, %337, %cst_88 [1] : vector<2x256xf32> to vector<2xf32>
      %339 = vector.shape_cast %338 : vector<2xf32> to vector<2x1xf32>
      %340 = vector.broadcast %cst_16 : f32 to vector<2x1xf32>
      %341 = arith.cmpf oge, %339, %340 : vector<2x1xf32>
      %342 = arith.select %341, %333, %324 : vector<2x1xi1>, vector<2x1xi32>
      %c1_i32_89 = arith.constant 1 : i32
      %343 = vector.broadcast %c1_i32_89 : i32 to vector<2x1xi32>
      %344 = arith.subi %333, %343 : vector<2x1xi32>
      %345 = arith.select %341, %327, %344 : vector<2x1xi1>, vector<2x1xi32>
      %c18_i32 = arith.constant 18 : i32
      %346 = arith.subi %345, %342 : vector<2x1xi32>
      %c1_i32_90 = arith.constant 1 : i32
      %347 = vector.broadcast %c1_i32_90 : i32 to vector<2x1xi32>
      %348 = arith.addi %346, %347 : vector<2x1xi32>
      %c1_i32_91 = arith.constant 1 : i32
      %349 = vector.broadcast %c1_i32_91 : i32 to vector<2x1xi32>
      %350 = arith.shrsi %348, %349 : vector<2x1xi32>
      %351 = arith.addi %342, %350 : vector<2x1xi32>
      %352 = vector.broadcast %351 : vector<2x1xi32> to vector<2x256xi32>
      %353 = arith.cmpi sge, %19, %352 : vector<2x256xi32>
      %354 = arith.extui %353 : vector<2x256xi1> to vector<2x256xi32>
      %355 = arith.sitofp %354 : vector<2x256xi32> to vector<2x256xf32>
      %cst_92 = arith.constant dense<0.000000e+00> : vector<2xf32>
      %356 = vector.multi_reduction <add>, %355, %cst_92 [1] : vector<2x256xf32> to vector<2xf32>
      %357 = vector.shape_cast %356 : vector<2xf32> to vector<2x1xf32>
      %358 = vector.broadcast %cst_16 : f32 to vector<2x1xf32>
      %359 = arith.cmpf oge, %357, %358 : vector<2x1xf32>
      %360 = arith.select %359, %351, %342 : vector<2x1xi1>, vector<2x1xi32>
      %c1_i32_93 = arith.constant 1 : i32
      %361 = vector.broadcast %c1_i32_93 : i32 to vector<2x1xi32>
      %362 = arith.subi %351, %361 : vector<2x1xi32>
      %363 = arith.select %359, %345, %362 : vector<2x1xi1>, vector<2x1xi32>
      %c19_i32 = arith.constant 19 : i32
      %364 = arith.subi %363, %360 : vector<2x1xi32>
      %c1_i32_94 = arith.constant 1 : i32
      %365 = vector.broadcast %c1_i32_94 : i32 to vector<2x1xi32>
      %366 = arith.addi %364, %365 : vector<2x1xi32>
      %c1_i32_95 = arith.constant 1 : i32
      %367 = vector.broadcast %c1_i32_95 : i32 to vector<2x1xi32>
      %368 = arith.shrsi %366, %367 : vector<2x1xi32>
      %369 = arith.addi %360, %368 : vector<2x1xi32>
      %370 = vector.broadcast %369 : vector<2x1xi32> to vector<2x256xi32>
      %371 = arith.cmpi sge, %19, %370 : vector<2x256xi32>
      %372 = arith.extui %371 : vector<2x256xi1> to vector<2x256xi32>
      %373 = arith.sitofp %372 : vector<2x256xi32> to vector<2x256xf32>
      %cst_96 = arith.constant dense<0.000000e+00> : vector<2xf32>
      %374 = vector.multi_reduction <add>, %373, %cst_96 [1] : vector<2x256xf32> to vector<2xf32>
      %375 = vector.shape_cast %374 : vector<2xf32> to vector<2x1xf32>
      %376 = vector.broadcast %cst_16 : f32 to vector<2x1xf32>
      %377 = arith.cmpf oge, %375, %376 : vector<2x1xf32>
      %378 = arith.select %377, %369, %360 : vector<2x1xi1>, vector<2x1xi32>
      %c1_i32_97 = arith.constant 1 : i32
      %379 = vector.broadcast %c1_i32_97 : i32 to vector<2x1xi32>
      %380 = arith.subi %369, %379 : vector<2x1xi32>
      %381 = arith.select %377, %363, %380 : vector<2x1xi1>, vector<2x1xi32>
      %c20_i32 = arith.constant 20 : i32
      %382 = arith.subi %381, %378 : vector<2x1xi32>
      %c1_i32_98 = arith.constant 1 : i32
      %383 = vector.broadcast %c1_i32_98 : i32 to vector<2x1xi32>
      %384 = arith.addi %382, %383 : vector<2x1xi32>
      %c1_i32_99 = arith.constant 1 : i32
      %385 = vector.broadcast %c1_i32_99 : i32 to vector<2x1xi32>
      %386 = arith.shrsi %384, %385 : vector<2x1xi32>
      %387 = arith.addi %378, %386 : vector<2x1xi32>
      %388 = vector.broadcast %387 : vector<2x1xi32> to vector<2x256xi32>
      %389 = arith.cmpi sge, %19, %388 : vector<2x256xi32>
      %390 = arith.extui %389 : vector<2x256xi1> to vector<2x256xi32>
      %391 = arith.sitofp %390 : vector<2x256xi32> to vector<2x256xf32>
      %cst_100 = arith.constant dense<0.000000e+00> : vector<2xf32>
      %392 = vector.multi_reduction <add>, %391, %cst_100 [1] : vector<2x256xf32> to vector<2xf32>
      %393 = vector.shape_cast %392 : vector<2xf32> to vector<2x1xf32>
      %394 = vector.broadcast %cst_16 : f32 to vector<2x1xf32>
      %395 = arith.cmpf oge, %393, %394 : vector<2x1xf32>
      %396 = arith.select %395, %387, %378 : vector<2x1xi1>, vector<2x1xi32>
      %c1_i32_101 = arith.constant 1 : i32
      %397 = vector.broadcast %c1_i32_101 : i32 to vector<2x1xi32>
      %398 = arith.subi %387, %397 : vector<2x1xi32>
      %399 = arith.select %395, %381, %398 : vector<2x1xi1>, vector<2x1xi32>
      %c21_i32 = arith.constant 21 : i32
      %400 = arith.subi %399, %396 : vector<2x1xi32>
      %c1_i32_102 = arith.constant 1 : i32
      %401 = vector.broadcast %c1_i32_102 : i32 to vector<2x1xi32>
      %402 = arith.addi %400, %401 : vector<2x1xi32>
      %c1_i32_103 = arith.constant 1 : i32
      %403 = vector.broadcast %c1_i32_103 : i32 to vector<2x1xi32>
      %404 = arith.shrsi %402, %403 : vector<2x1xi32>
      %405 = arith.addi %396, %404 : vector<2x1xi32>
      %406 = vector.broadcast %405 : vector<2x1xi32> to vector<2x256xi32>
      %407 = arith.cmpi sge, %19, %406 : vector<2x256xi32>
      %408 = arith.extui %407 : vector<2x256xi1> to vector<2x256xi32>
      %409 = arith.sitofp %408 : vector<2x256xi32> to vector<2x256xf32>
      %cst_104 = arith.constant dense<0.000000e+00> : vector<2xf32>
      %410 = vector.multi_reduction <add>, %409, %cst_104 [1] : vector<2x256xf32> to vector<2xf32>
      %411 = vector.shape_cast %410 : vector<2xf32> to vector<2x1xf32>
      %412 = vector.broadcast %cst_16 : f32 to vector<2x1xf32>
      %413 = arith.cmpf oge, %411, %412 : vector<2x1xf32>
      %414 = arith.select %413, %405, %396 : vector<2x1xi1>, vector<2x1xi32>
      %c1_i32_105 = arith.constant 1 : i32
      %415 = vector.broadcast %c1_i32_105 : i32 to vector<2x1xi32>
      %416 = arith.subi %405, %415 : vector<2x1xi32>
      %417 = arith.select %413, %399, %416 : vector<2x1xi1>, vector<2x1xi32>
      %c22_i32 = arith.constant 22 : i32
      %418 = arith.subi %417, %414 : vector<2x1xi32>
      %c1_i32_106 = arith.constant 1 : i32
      %419 = vector.broadcast %c1_i32_106 : i32 to vector<2x1xi32>
      %420 = arith.addi %418, %419 : vector<2x1xi32>
      %c1_i32_107 = arith.constant 1 : i32
      %421 = vector.broadcast %c1_i32_107 : i32 to vector<2x1xi32>
      %422 = arith.shrsi %420, %421 : vector<2x1xi32>
      %423 = arith.addi %414, %422 : vector<2x1xi32>
      %424 = vector.broadcast %423 : vector<2x1xi32> to vector<2x256xi32>
      %425 = arith.cmpi sge, %19, %424 : vector<2x256xi32>
      %426 = arith.extui %425 : vector<2x256xi1> to vector<2x256xi32>
      %427 = arith.sitofp %426 : vector<2x256xi32> to vector<2x256xf32>
      %cst_108 = arith.constant dense<0.000000e+00> : vector<2xf32>
      %428 = vector.multi_reduction <add>, %427, %cst_108 [1] : vector<2x256xf32> to vector<2xf32>
      %429 = vector.shape_cast %428 : vector<2xf32> to vector<2x1xf32>
      %430 = vector.broadcast %cst_16 : f32 to vector<2x1xf32>
      %431 = arith.cmpf oge, %429, %430 : vector<2x1xf32>
      %432 = arith.select %431, %423, %414 : vector<2x1xi1>, vector<2x1xi32>
      %c1_i32_109 = arith.constant 1 : i32
      %433 = vector.broadcast %c1_i32_109 : i32 to vector<2x1xi32>
      %434 = arith.subi %423, %433 : vector<2x1xi32>
      %435 = arith.select %431, %417, %434 : vector<2x1xi1>, vector<2x1xi32>
      %c23_i32 = arith.constant 23 : i32
      %436 = arith.subi %435, %432 : vector<2x1xi32>
      %c1_i32_110 = arith.constant 1 : i32
      %437 = vector.broadcast %c1_i32_110 : i32 to vector<2x1xi32>
      %438 = arith.addi %436, %437 : vector<2x1xi32>
      %c1_i32_111 = arith.constant 1 : i32
      %439 = vector.broadcast %c1_i32_111 : i32 to vector<2x1xi32>
      %440 = arith.shrsi %438, %439 : vector<2x1xi32>
      %441 = arith.addi %432, %440 : vector<2x1xi32>
      %442 = vector.broadcast %441 : vector<2x1xi32> to vector<2x256xi32>
      %443 = arith.cmpi sge, %19, %442 : vector<2x256xi32>
      %444 = arith.extui %443 : vector<2x256xi1> to vector<2x256xi32>
      %445 = arith.sitofp %444 : vector<2x256xi32> to vector<2x256xf32>
      %cst_112 = arith.constant dense<0.000000e+00> : vector<2xf32>
      %446 = vector.multi_reduction <add>, %445, %cst_112 [1] : vector<2x256xf32> to vector<2xf32>
      %447 = vector.shape_cast %446 : vector<2xf32> to vector<2x1xf32>
      %448 = vector.broadcast %cst_16 : f32 to vector<2x1xf32>
      %449 = arith.cmpf oge, %447, %448 : vector<2x1xf32>
      %450 = arith.select %449, %441, %432 : vector<2x1xi1>, vector<2x1xi32>
      %c1_i32_113 = arith.constant 1 : i32
      %451 = vector.broadcast %c1_i32_113 : i32 to vector<2x1xi32>
      %452 = arith.subi %441, %451 : vector<2x1xi32>
      %453 = arith.select %449, %435, %452 : vector<2x1xi1>, vector<2x1xi32>
      %c24_i32 = arith.constant 24 : i32
      %454 = arith.subi %453, %450 : vector<2x1xi32>
      %c1_i32_114 = arith.constant 1 : i32
      %455 = vector.broadcast %c1_i32_114 : i32 to vector<2x1xi32>
      %456 = arith.addi %454, %455 : vector<2x1xi32>
      %c1_i32_115 = arith.constant 1 : i32
      %457 = vector.broadcast %c1_i32_115 : i32 to vector<2x1xi32>
      %458 = arith.shrsi %456, %457 : vector<2x1xi32>
      %459 = arith.addi %450, %458 : vector<2x1xi32>
      %460 = vector.broadcast %459 : vector<2x1xi32> to vector<2x256xi32>
      %461 = arith.cmpi sge, %19, %460 : vector<2x256xi32>
      %462 = arith.extui %461 : vector<2x256xi1> to vector<2x256xi32>
      %463 = arith.sitofp %462 : vector<2x256xi32> to vector<2x256xf32>
      %cst_116 = arith.constant dense<0.000000e+00> : vector<2xf32>
      %464 = vector.multi_reduction <add>, %463, %cst_116 [1] : vector<2x256xf32> to vector<2xf32>
      %465 = vector.shape_cast %464 : vector<2xf32> to vector<2x1xf32>
      %466 = vector.broadcast %cst_16 : f32 to vector<2x1xf32>
      %467 = arith.cmpf oge, %465, %466 : vector<2x1xf32>
      %468 = arith.select %467, %459, %450 : vector<2x1xi1>, vector<2x1xi32>
      %c1_i32_117 = arith.constant 1 : i32
      %469 = vector.broadcast %c1_i32_117 : i32 to vector<2x1xi32>
      %470 = arith.subi %459, %469 : vector<2x1xi32>
      %471 = arith.select %467, %453, %470 : vector<2x1xi1>, vector<2x1xi32>
      %c25_i32 = arith.constant 25 : i32
      %472 = arith.subi %471, %468 : vector<2x1xi32>
      %c1_i32_118 = arith.constant 1 : i32
      %473 = vector.broadcast %c1_i32_118 : i32 to vector<2x1xi32>
      %474 = arith.addi %472, %473 : vector<2x1xi32>
      %c1_i32_119 = arith.constant 1 : i32
      %475 = vector.broadcast %c1_i32_119 : i32 to vector<2x1xi32>
      %476 = arith.shrsi %474, %475 : vector<2x1xi32>
      %477 = arith.addi %468, %476 : vector<2x1xi32>
      %478 = vector.broadcast %477 : vector<2x1xi32> to vector<2x256xi32>
      %479 = arith.cmpi sge, %19, %478 : vector<2x256xi32>
      %480 = arith.extui %479 : vector<2x256xi1> to vector<2x256xi32>
      %481 = arith.sitofp %480 : vector<2x256xi32> to vector<2x256xf32>
      %cst_120 = arith.constant dense<0.000000e+00> : vector<2xf32>
      %482 = vector.multi_reduction <add>, %481, %cst_120 [1] : vector<2x256xf32> to vector<2xf32>
      %483 = vector.shape_cast %482 : vector<2xf32> to vector<2x1xf32>
      %484 = vector.broadcast %cst_16 : f32 to vector<2x1xf32>
      %485 = arith.cmpf oge, %483, %484 : vector<2x1xf32>
      %486 = arith.select %485, %477, %468 : vector<2x1xi1>, vector<2x1xi32>
      %c1_i32_121 = arith.constant 1 : i32
      %487 = vector.broadcast %c1_i32_121 : i32 to vector<2x1xi32>
      %488 = arith.subi %477, %487 : vector<2x1xi32>
      %489 = arith.select %485, %471, %488 : vector<2x1xi1>, vector<2x1xi32>
      %c26_i32 = arith.constant 26 : i32
      %490 = arith.subi %489, %486 : vector<2x1xi32>
      %c1_i32_122 = arith.constant 1 : i32
      %491 = vector.broadcast %c1_i32_122 : i32 to vector<2x1xi32>
      %492 = arith.addi %490, %491 : vector<2x1xi32>
      %c1_i32_123 = arith.constant 1 : i32
      %493 = vector.broadcast %c1_i32_123 : i32 to vector<2x1xi32>
      %494 = arith.shrsi %492, %493 : vector<2x1xi32>
      %495 = arith.addi %486, %494 : vector<2x1xi32>
      %496 = vector.broadcast %495 : vector<2x1xi32> to vector<2x256xi32>
      %497 = arith.cmpi sge, %19, %496 : vector<2x256xi32>
      %498 = arith.extui %497 : vector<2x256xi1> to vector<2x256xi32>
      %499 = arith.sitofp %498 : vector<2x256xi32> to vector<2x256xf32>
      %cst_124 = arith.constant dense<0.000000e+00> : vector<2xf32>
      %500 = vector.multi_reduction <add>, %499, %cst_124 [1] : vector<2x256xf32> to vector<2xf32>
      %501 = vector.shape_cast %500 : vector<2xf32> to vector<2x1xf32>
      %502 = vector.broadcast %cst_16 : f32 to vector<2x1xf32>
      %503 = arith.cmpf oge, %501, %502 : vector<2x1xf32>
      %504 = arith.select %503, %495, %486 : vector<2x1xi1>, vector<2x1xi32>
      %c1_i32_125 = arith.constant 1 : i32
      %505 = vector.broadcast %c1_i32_125 : i32 to vector<2x1xi32>
      %506 = arith.subi %495, %505 : vector<2x1xi32>
      %507 = arith.select %503, %489, %506 : vector<2x1xi1>, vector<2x1xi32>
      %c27_i32 = arith.constant 27 : i32
      %508 = arith.subi %507, %504 : vector<2x1xi32>
      %c1_i32_126 = arith.constant 1 : i32
      %509 = vector.broadcast %c1_i32_126 : i32 to vector<2x1xi32>
      %510 = arith.addi %508, %509 : vector<2x1xi32>
      %c1_i32_127 = arith.constant 1 : i32
      %511 = vector.broadcast %c1_i32_127 : i32 to vector<2x1xi32>
      %512 = arith.shrsi %510, %511 : vector<2x1xi32>
      %513 = arith.addi %504, %512 : vector<2x1xi32>
      %514 = vector.broadcast %513 : vector<2x1xi32> to vector<2x256xi32>
      %515 = arith.cmpi sge, %19, %514 : vector<2x256xi32>
      %516 = arith.extui %515 : vector<2x256xi1> to vector<2x256xi32>
      %517 = arith.sitofp %516 : vector<2x256xi32> to vector<2x256xf32>
      %cst_128 = arith.constant dense<0.000000e+00> : vector<2xf32>
      %518 = vector.multi_reduction <add>, %517, %cst_128 [1] : vector<2x256xf32> to vector<2xf32>
      %519 = vector.shape_cast %518 : vector<2xf32> to vector<2x1xf32>
      %520 = vector.broadcast %cst_16 : f32 to vector<2x1xf32>
      %521 = arith.cmpf oge, %519, %520 : vector<2x1xf32>
      %522 = arith.select %521, %513, %504 : vector<2x1xi1>, vector<2x1xi32>
      %c1_i32_129 = arith.constant 1 : i32
      %523 = vector.broadcast %c1_i32_129 : i32 to vector<2x1xi32>
      %524 = arith.subi %513, %523 : vector<2x1xi32>
      %525 = arith.select %521, %507, %524 : vector<2x1xi1>, vector<2x1xi32>
      %c28_i32 = arith.constant 28 : i32
      %526 = arith.subi %525, %522 : vector<2x1xi32>
      %c1_i32_130 = arith.constant 1 : i32
      %527 = vector.broadcast %c1_i32_130 : i32 to vector<2x1xi32>
      %528 = arith.addi %526, %527 : vector<2x1xi32>
      %c1_i32_131 = arith.constant 1 : i32
      %529 = vector.broadcast %c1_i32_131 : i32 to vector<2x1xi32>
      %530 = arith.shrsi %528, %529 : vector<2x1xi32>
      %531 = arith.addi %522, %530 : vector<2x1xi32>
      %532 = vector.broadcast %531 : vector<2x1xi32> to vector<2x256xi32>
      %533 = arith.cmpi sge, %19, %532 : vector<2x256xi32>
      %534 = arith.extui %533 : vector<2x256xi1> to vector<2x256xi32>
      %535 = arith.sitofp %534 : vector<2x256xi32> to vector<2x256xf32>
      %cst_132 = arith.constant dense<0.000000e+00> : vector<2xf32>
      %536 = vector.multi_reduction <add>, %535, %cst_132 [1] : vector<2x256xf32> to vector<2xf32>
      %537 = vector.shape_cast %536 : vector<2xf32> to vector<2x1xf32>
      %538 = vector.broadcast %cst_16 : f32 to vector<2x1xf32>
      %539 = arith.cmpf oge, %537, %538 : vector<2x1xf32>
      %540 = arith.select %539, %531, %522 : vector<2x1xi1>, vector<2x1xi32>
      %c1_i32_133 = arith.constant 1 : i32
      %541 = vector.broadcast %c1_i32_133 : i32 to vector<2x1xi32>
      %542 = arith.subi %531, %541 : vector<2x1xi32>
      %543 = arith.select %539, %525, %542 : vector<2x1xi1>, vector<2x1xi32>
      %c29_i32 = arith.constant 29 : i32
      %544 = arith.subi %543, %540 : vector<2x1xi32>
      %c1_i32_134 = arith.constant 1 : i32
      %545 = vector.broadcast %c1_i32_134 : i32 to vector<2x1xi32>
      %546 = arith.addi %544, %545 : vector<2x1xi32>
      %c1_i32_135 = arith.constant 1 : i32
      %547 = vector.broadcast %c1_i32_135 : i32 to vector<2x1xi32>
      %548 = arith.shrsi %546, %547 : vector<2x1xi32>
      %549 = arith.addi %540, %548 : vector<2x1xi32>
      %550 = vector.broadcast %549 : vector<2x1xi32> to vector<2x256xi32>
      %551 = arith.cmpi sge, %19, %550 : vector<2x256xi32>
      %552 = arith.extui %551 : vector<2x256xi1> to vector<2x256xi32>
      %553 = arith.sitofp %552 : vector<2x256xi32> to vector<2x256xf32>
      %cst_136 = arith.constant dense<0.000000e+00> : vector<2xf32>
      %554 = vector.multi_reduction <add>, %553, %cst_136 [1] : vector<2x256xf32> to vector<2xf32>
      %555 = vector.shape_cast %554 : vector<2xf32> to vector<2x1xf32>
      %556 = vector.broadcast %cst_16 : f32 to vector<2x1xf32>
      %557 = arith.cmpf oge, %555, %556 : vector<2x1xf32>
      %558 = arith.select %557, %549, %540 : vector<2x1xi1>, vector<2x1xi32>
      %c1_i32_137 = arith.constant 1 : i32
      %559 = vector.broadcast %c1_i32_137 : i32 to vector<2x1xi32>
      %560 = arith.subi %549, %559 : vector<2x1xi32>
      %561 = arith.select %557, %543, %560 : vector<2x1xi1>, vector<2x1xi32>
      %c30_i32 = arith.constant 30 : i32
      %562 = arith.subi %561, %558 : vector<2x1xi32>
      %c1_i32_138 = arith.constant 1 : i32
      %563 = vector.broadcast %c1_i32_138 : i32 to vector<2x1xi32>
      %564 = arith.addi %562, %563 : vector<2x1xi32>
      %c1_i32_139 = arith.constant 1 : i32
      %565 = vector.broadcast %c1_i32_139 : i32 to vector<2x1xi32>
      %566 = arith.shrsi %564, %565 : vector<2x1xi32>
      %567 = arith.addi %558, %566 : vector<2x1xi32>
      %568 = vector.broadcast %567 : vector<2x1xi32> to vector<2x256xi32>
      %569 = arith.cmpi sge, %19, %568 : vector<2x256xi32>
      %570 = arith.extui %569 : vector<2x256xi1> to vector<2x256xi32>
      %571 = arith.sitofp %570 : vector<2x256xi32> to vector<2x256xf32>
      %cst_140 = arith.constant dense<0.000000e+00> : vector<2xf32>
      %572 = vector.multi_reduction <add>, %571, %cst_140 [1] : vector<2x256xf32> to vector<2xf32>
      %573 = vector.shape_cast %572 : vector<2xf32> to vector<2x1xf32>
      %574 = vector.broadcast %cst_16 : f32 to vector<2x1xf32>
      %575 = arith.cmpf oge, %573, %574 : vector<2x1xf32>
      %576 = arith.select %575, %567, %558 : vector<2x1xi1>, vector<2x1xi32>
      %c1_i32_141 = arith.constant 1 : i32
      %577 = vector.broadcast %c1_i32_141 : i32 to vector<2x1xi32>
      %578 = arith.subi %567, %577 : vector<2x1xi32>
      %579 = arith.select %575, %561, %578 : vector<2x1xi1>, vector<2x1xi32>
      %580 = tpu.bitcast %576 : vector<2x1xi32> -> vector<2x1xf32>
      %581 = tpu.bitcast %19 : vector<2x256xi32> -> vector<2x256xf32>
      %582 = vector.broadcast %576 : vector<2x1xi32> to vector<2x256xi32>
      %583 = arith.cmpi sgt, %19, %582 : vector<2x256xi32>
      %584 = arith.extui %583 : vector<2x256xi1> to vector<2x256xi32>
      %585 = arith.sitofp %584 : vector<2x256xi32> to vector<2x256xf32>
      %cst_142 = arith.constant dense<0.000000e+00> : vector<2xf32>
      %586 = vector.multi_reduction <add>, %585, %cst_142 [1] : vector<2x256xf32> to vector<2xf32>
      %587 = vector.shape_cast %586 : vector<2xf32> to vector<2x1xf32>
      %cst_143 = arith.constant 0.000000e+00 : f32
      %588 = vector.broadcast %cst_143 : f32 to vector<2x256xf32>
      %589 = arith.select %583, %581, %588 : vector<2x256xi1>, vector<2x256xf32>
      %cst_144 = arith.constant dense<0.000000e+00> : vector<2xf32>
      %590 = vector.multi_reduction <add>, %589, %cst_144 [1] : vector<2x256xf32> to vector<2xf32>
      %591 = vector.shape_cast %590 : vector<2xf32> to vector<2x1xf32>
      %cst_145 = arith.constant 2.500000e+01 : f32
      %592 = vector.broadcast %cst_145 : f32 to vector<2x1xf32>
      %593 = arith.subf %592, %587 : vector<2x1xf32>
      %594 = arith.mulf %580, %593 : vector<2x1xf32>
      %595 = arith.addf %591, %594 : vector<2x1xf32>
      %cst_146 = arith.constant 2.500000e+01 : f32
      %596 = vector.broadcast %cst_146 : f32 to vector<2x1xf32>
      %597 = arith.divf %595, %596 : vector<2x1xf32>
      %c0_147 = arith.constant 0 : index
      %c0_148 = arith.constant 0 : index
      %598 = vector.load %arg5[%c0_147, %c0_148] : memref<2x1xf32, #tpu.memory_space<vmem>>, vector<2x1xf32>
      tpu.vector_store %arg5[%c0_147, %c0_148], %597 {strides = array<i32>} : memref<2x1xf32, #tpu.memory_space<vmem>>, vector<2x1xf32>,
    } else {
    }
    return
  }
  func.func @transform_0(%arg0: i32, %arg1: i32) -> (i32, i32, i32) {
    %c0_i32 = arith.constant 0 : i32
    %c0_i32_0 = arith.constant 0 : i32
    return %arg0, %arg1, %c0_i32 : i32, i32, i32
  }
  func.func @transform_1(%arg0: i32, %arg1: i32) -> (i32, i32, i32) {
    %c0_i32 = arith.constant 0 : i32
    %c0_i32_0 = arith.constant 0 : i32
    %c0_i32_1 = arith.constant 0 : i32
    return %c0_i32, %arg1, %c0_i32_0 : i32, i32, i32
  }
  func.func @transform_2(%arg0: i32, %arg1: i32) -> i32 {
    %c0_i32 = arith.constant 0 : i32
    %c0_i32_0 = arith.constant 0 : i32
    return %c0_i32 : i32
  }
  func.func @transform_3(%arg0: i32, %arg1: i32) -> (i32, i32) {
    %c0_i32 = arith.constant 0 : i32
    %c0_i32_0 = arith.constant 0 : i32
    return %arg0, %c0_i32 : i32, i32
  }
}

</mosaic_0001>

<bundles_post_ra>
// kernel: tpu_custom_call.1
= control target key start
LH: loop header
LB: loop body
LE: loop exit
PB: predicated region body
PF: predicated region fallthrough
CT: control target
= control target key end

     0   :  { %9 = vsyncpa [#allocation5], 0  ;;  %s882_s12 = smov [#allocation4]   ;;  %s1136_s0 = inlined_call_operand.hbm [shape: f32[2,4,256], index: 0, kind: input, shape index: {}]   ;;  %s1137_s1 = inlined_call_operand.vmem [shape: f32[1,4,1], index: 1, kind: input, shape index: {}]   ;;  %s1138_s2 = inlined_call_operand.<no memory space> [shape: f32[1], index: 2, kind: input, shape index: {}]   ;;  %s1139_s3 = inlined_call_operand.vmem [shape: f32[2,1], index: 3, kind: output, shape index: {}]  }
   0x1   :  { %s15_s13 = sshll.u32 %s882_s12, 4  ;;  %s858_s16 = scalar_lea.hbm %s1136_s0, 256  ;;  %s16_s13 = int_to_ptr.vmem [resolvable:$true] %s15_s13 }
   0x2   :  { %p859_p0 = scmp.ne.s32.totalorder %s1136_s0, %s858_s16  ;;  %p862_p1 = scmp.lt.u32.totalorder %s858_s16, %s1136_s0 }
   0x4   :  { %p864_p2 = pnand %p862_p1, %p859_p0 }
   0x6   :  { %867 = shalt.err (!%p864_p2)
}
   0x7   :  { %s868_s21 = scalar_lea.vmem %s16_s13, 256  ;;  %p873_p4 = scmp.lt.s32.totalorder %s16_s13, %s16_s13 }
   0x8   :  { %p869_p3 = scmp.ne.s32.totalorder %s16_s13, %s868_s21  ;;  %p874_p5 = scmp.lt.s32.totalorder %s868_s21, %s868_s21 }
   0xa   :  { %p875_p6 = por %p874_p5, %p873_p4 }
   0xc   :  { %p876_p7 = pnand %p875_p6, %p869_p3 }
   0xe   :  { %879 = shalt.err (!%p876_p7)
}
   0xf   :  { %s883_s22 = smov 128   ;;  %s884_s23 = smov 8  }
  0x10   :  { %21 = dma.hbm_to_vmem [thread:$0]  %s1136_s0, 256, %s16_s13, [#allocation5], %s883_s22, %s883_s22, %s884_s23  }
  0x11   :  { %880 = dma.done.wait [#allocation5], 256  }
  0x12   :  { %881 = vsyncadd [#allocation5], 4294967040  ;;  %v885_v0 = vmov 0.0   ;;  %v886_v1 = vmov 0   ;;  %v37_v2 = vld [vmem:[%s1137_s1] sm:$0xf]  ;;  %v45_v5 = vlaneseq  ;;  %v128_v60 = vstv %s1138_s2 }
  0x13   :  { %33 = vst [vmem:[#allocation2] sm:$0xf] %v885_v0  ;;  %857 = vset.pattern.permute.xlu0 %v886_v1  ;;  %v887_v3 = vmov 839922192   ;;  %v34_v10 = vld [vmem:[#allocation4] sm:$0xff]  ;;  %v35_v11 = vld [vmem:[#allocation4 + $0x8] sm:$0xff] }
  0x14   :  { %40 = vperm.xlu0 %857, %v37_v2   ;;  %v43_v4 = vunpack.c.l.s4 %v887_v3  ;;  %v46_v7 = vshrl.u32 %v45_v5, 7  ;;  %vm58_vm0 = vcmask 1043456   ;;  %v888_v27 = vmov 1983009808  }
  0x15   :  { %v93_v28 = vunpack.c.l.s4 %v888_v27  ;;  %vm112_vm1 = vcmask 1041409   ;;  %vm114_vm2 = vcmask 1043459   ;;  %vm116_vm3 = vcmask 1045509  }
  0x16   :  { %v44_v6 = vunpack.c.0.s8 %v43_v4  ;;  %vm118_vm4 = vcmask 1047559   ;;  %vm148_vm6 = vcmask 1041408  }
  0x17   :  { %v94_v37 = vunpack.c.0.s8 %v93_v28 }
  0x18   :  { %v47_v8 = vsub.s32 %v44_v6, %v46_v7 }
  0x19   :  { %v97_v44 = vsub.s32 %v94_v37, %v46_v7 }
  0x1a   :  { %v36_v55 = vld [vmem:[#allocation2] sm:$0xf] }
  0x93   :  { %v41_v9 = vpop.permute.xlu0 %40 }
  0x94   :  { %v48_v12 = vrot.slane %v41_v9, %v47_v8 }
  0x96   :  { %v50_v13 = vmul.f32 %v48_v12, %v34_v10  ;;  %v51_v14 = vmul.f32 %v48_v12, %v35_v11  ;;  %v889_v11 = vmov 1069547519  }
  0x98   :  { %v54_v15 = vcombine.high %v50_v13, %v50_v13  ;;  %v55_v16 = vcombine.high %v51_v14, %v51_v14  ;;  %v59_v17 = vsel %vm58_vm0, %v50_v13, 0.0  ;;  %v73_v18 = vsel %vm58_vm0, %v51_v14, 0.0 }
  0x99   :  { %v60_v19 = vrot.slane %v59_v17, 4  ;;  %v74_v20 = vrot.slane %v73_v18, 4 }
  0x9a   :  { %v66_v21 = vsel %vm58_vm0, %v54_v15, 0.0  ;;  %v80_v22 = vsel %vm58_vm0, %v55_v16, 0.0 }
  0x9b   :  { %v61_v23 = vadd.f32 %v60_v19, %v59_v17  ;;  %v67_v24 = vrot.slane %v66_v21, 4  ;;  %v75_v25 = vadd.f32 %v74_v20, %v73_v18  ;;  %v81_v26 = vrot.slane %v80_v22, 4 }
  0x9d   :  { %v62_v29 = vrot.slane %v61_v23, 2  ;;  %v68_v30 = vadd.f32 %v67_v24, %v66_v21  ;;  %v76_v31 = vrot.slane %v75_v25, 2  ;;  %v82_v32 = vadd.f32 %v81_v26, %v80_v22 }
  0x9f   :  { %v63_v33 = vadd.f32 %v62_v29, %v61_v23  ;;  %v69_v34 = vrot.slane %v68_v30, 2  ;;  %v77_v35 = vadd.f32 %v76_v31, %v75_v25  ;;  %v83_v36 = vrot.slane %v82_v32, 2 }
  0xa1   :  { %v64_v38 = vrot.slane %v63_v33, 1  ;;  %v70_v39 = vadd.f32 %v69_v34, %v68_v30  ;;  %v78_v40 = vrot.slane %v77_v35, 1  ;;  %v84_v41 = vadd.f32 %v83_v36, %v82_v32 }
  0xa3   :  { %v71_v42 = vrot.slane %v70_v39, 1  ;;  %v85_v43 = vrot.slane %v84_v41, 1  ;;  %v65_v45 = vadd.f32 %v64_v38, %v63_v33  ;;  %v79_v47 = vadd.f32 %v78_v40, %v77_v35 }
  0xa5   :  { %v72_v46 = vadd.f32 %v71_v42, %v70_v39  ;;  %v86_v48 = vadd.f32 %v85_v43, %v84_v41 }
  0xa7   :  { %v91_v49 = vcombine.low %v65_v45, %v72_v46  ;;  %v99_v50 = vcombine.low %v79_v47, %v86_v48 }
  0xa9   :  { %v106_v51 = vrot.slane %v99_v50, %v97_v44  ;;  %v98_v52 = vrot.slane %v91_v49, %v97_v44 }
  0xab   :  { %v111_v53 = vrot.slane %v106_v51, 7 }
  0xad   :  { %v113_v54 = vsel %vm112_vm1, %v111_v53, %v98_v52 }
  0xae   :  { %v115_v56 = vsel %vm114_vm2, %v111_v53, %v113_v54 }
  0xaf   :  { %v117_v57 = vsel %vm116_vm3, %v111_v53, %v115_v56 }
  0xb0   :  { %v119_v58 = vsel %vm118_vm4, %v111_v53, %v117_v57 }
  0xb1   :  { %v121_v59 = vadd.f32 %v119_v58, %v36_v55 }
  0xb3   :  { %122 = vst [vmem:[#allocation2] sm:$0xf] %v121_v59 }
  0xba   :  { %v126_v61 = vld [vmem:[#allocation2] sm:$0xf] }
  0xbb   :  { %v129_v62 = vadd.f32 %v128_v60, %v126_v61 }
  0xbd   :  { %v130_v63 = vand.u32 2147483647, %v129_v62 }
  0xbf   :  { %v930_v2 = vrot.slane %v130_v63, %v97_v44 }
  0xc1   :  { %v934_v3 = vcombine.high %v930_v2, %v930_v2  ;;  %vm142_vm5 = vcmp.ge.s32.totalorder %v930_v2, 1069547520 }
  0xc2   :  { %v756_v4 = vsel %vm142_vm5, 1.0, %v885_v0 }
  0xc3   :  { %vm143_vm7 = vcmp.ge.s32.totalorder %v934_v3, 1069547520  ;;  %v149_v6 = vsel %vm148_vm6, %v756_v4, 0.0 }
  0xc4   :  { %v757_v5 = vsel %vm143_vm7, 1.0, %v885_v0 }
  0xc5   :  { %v150_v7 = vsel %vm148_vm6, %v757_v5, 0.0 }
  0xc6   :  { %v151_v8 = vadd.f32 %v150_v7, %v149_v6 }
  0xc8   :  { %152 = vadd.xlane.f32.xlu0 %v151_v8 }
 0x155   :  { %v153_v9 = vpop.xlane.xlu0 %152 }
 0x156   :  { %vm154_vm8 = vcmp.ge.f32.partialorder %v153_v9, 25.0 }
 0x157   :  { %v155_v10 = vsel %vm154_vm8, 1069547520, %v886_v1  ;;  %v156_v12 = vsel %vm154_vm8, 2139095040, %v889_v11 }
 0x158   :  { %v157_v13 = vsub.s32 %v156_v12, %v155_v10 }
 0x15a   :  { %v158_v14 = vadd.s32 1, %v157_v13 }
 0x15c   :  { %v159_v15 = vshra.s32 %v158_v14, 1 }
 0x15e   :  { %v160_v16 = vadd.s32 %v159_v15, %v155_v10 }
 0x160   :  { %vm161_vm9 = vcmp.ge.s32.totalorder %v930_v2, %v160_v16  ;;  %vm162_vm10 = vcmp.ge.s32.totalorder %v934_v3, %v160_v16  ;;  %v760_v1 = vadd.s32 4294967295, %v160_v16 }
 0x161   :  { %v758_v17 = vsel %vm161_vm9, 1.0, %v885_v0  ;;  %v759_v18 = vsel %vm162_vm10, 1.0, %v885_v0 }
 0x162   :  { %v167_v19 = vsel %vm148_vm6, %v758_v17, 0.0  ;;  %v168_v20 = vsel %vm148_vm6, %v759_v18, 0.0 }
 0x163   :  { %v169_v21 = vadd.f32 %v168_v20, %v167_v19 }
 0x165   :  { %170 = vadd.xlane.f32.xlu1 %v169_v21 }
 0x1f2   :  { %v171_v22 = vpop.xlane.xlu1 %170 }
 0x1f3   :  { %vm172_vm11 = vcmp.ge.f32.partialorder %v171_v22, 25.0 }
 0x1f4   :  { %v173_v23 = vsel %vm172_vm11, %v160_v16, %v155_v10  ;;  %v175_v24 = vsel %vm172_vm11, %v156_v12, %v760_v1 }
 0x1f5   :  { %v176_v25 = vsub.s32 %v175_v24, %v173_v23 }
 0x1f7   :  { %v177_v26 = vadd.s32 1, %v176_v25 }
 0x1f9   :  { %v178_v27 = vshra.s32 %v177_v26, 1 }
 0x1fb   :  { %v179_v28 = vadd.s32 %v178_v27, %v173_v23 }
 0x1fd   :  { %vm180_vm12 = vcmp.ge.s32.totalorder %v930_v2, %v179_v28  ;;  %vm181_vm13 = vcmp.ge.s32.totalorder %v934_v3, %v179_v28  ;;  %v763_v34 = vadd.s32 4294967295, %v179_v28 }
 0x1fe   :  { %v761_v29 = vsel %vm180_vm12, 1.0, %v885_v0  ;;  %v762_v30 = vsel %vm181_vm13, 1.0, %v885_v0 }
 0x1ff   :  { %v186_v31 = vsel %vm148_vm6, %v761_v29, 0.0  ;;  %v187_v32 = vsel %vm148_vm6, %v762_v30, 0.0 }
 0x200   :  { %v188_v33 = vadd.f32 %v187_v32, %v186_v31 }
 0x202   :  { %189 = vadd.xlane.f32.xlu1 %v188_v33 }
 0x28f   :  { %v190_v35 = vpop.xlane.xlu1 %189 }
 0x290   :  { %vm191_vm14 = vcmp.ge.f32.partialorder %v190_v35, 25.0 }
 0x291   :  { %v192_v36 = vsel %vm191_vm14, %v179_v28, %v173_v23  ;;  %v194_v37 = vsel %vm191_vm14, %v175_v24, %v763_v34 }
 0x292   :  { %v195_v38 = vsub.s32 %v194_v37, %v192_v36 }
 0x294   :  { %v196_v39 = vadd.s32 1, %v195_v38 }
 0x296   :  { %v197_v40 = vshra.s32 %v196_v39, 1 }
 0x298   :  { %v198_v41 = vadd.s32 %v197_v40, %v192_v36 }
 0x29a   :  { %vm199_vm15 = vcmp.ge.s32.totalorder %v930_v2, %v198_v41  ;;  %vm200_vm0 = vcmp.ge.s32.totalorder %v934_v3, %v198_v41  ;;  %v766_v47 = vadd.s32 4294967295, %v198_v41 }
 0x29b   :  { %v764_v42 = vsel %vm199_vm15, 1.0, %v885_v0  ;;  %v765_v43 = vsel %vm200_vm0, 1.0, %v885_v0 }
 0x29c   :  { %v205_v44 = vsel %vm148_vm6, %v764_v42, 0.0  ;;  %v206_v45 = vsel %vm148_vm6, %v765_v43, 0.0 }
 0x29d   :  { %v207_v46 = vadd.f32 %v206_v45, %v205_v44 }
 0x29f   :  { %208 = vadd.xlane.f32.xlu1 %v207_v46 }
 0x32c   :  { %v209_v48 = vpop.xlane.xlu1 %208 }
 0x32d   :  { %vm210_vm1 = vcmp.ge.f32.partialorder %v209_v48, 25.0 }
 0x32e   :  { %v211_v49 = vsel %vm210_vm1, %v198_v41, %v192_v36  ;;  %v213_v50 = vsel %vm210_vm1, %v194_v37, %v766_v47 }
 0x32f   :  { %v214_v51 = vsub.s32 %v213_v50, %v211_v49 }
 0x331   :  { %v215_v52 = vadd.s32 1, %v214_v51 }
 0x333   :  { %v216_v53 = vshra.s32 %v215_v52, 1 }
 0x335   :  { %v217_v54 = vadd.s32 %v216_v53, %v211_v49 }
 0x337   :  { %vm218_vm2 = vcmp.ge.s32.totalorder %v930_v2, %v217_v54  ;;  %vm219_vm3 = vcmp.ge.s32.totalorder %v934_v3, %v217_v54  ;;  %v769_v60 = vadd.s32 4294967295, %v217_v54 }
 0x338   :  { %v767_v55 = vsel %vm218_vm2, 1.0, %v885_v0  ;;  %v768_v56 = vsel %vm219_vm3, 1.0, %v885_v0 }
 0x339   :  { %v224_v57 = vsel %vm148_vm6, %v767_v55, 0.0  ;;  %v225_v58 = vsel %vm148_vm6, %v768_v56, 0.0 }
 0x33a   :  { %v226_v59 = vadd.f32 %v225_v58, %v224_v57 }
 0x33c   :  { %227 = vadd.xlane.f32.xlu1 %v226_v59 }
 0x3c9   :  { %v228_v61 = vpop.xlane.xlu1 %227 }
 0x3ca   :  { %vm229_vm4 = vcmp.ge.f32.partialorder %v228_v61, 25.0 }
 0x3cb   :  { %v230_v62 = vsel %vm229_vm4, %v217_v54, %v211_v49  ;;  %v232_v63 = vsel %vm229_vm4, %v213_v50, %v769_v60 }
 0x3cc   :  { %v233_v4 = vsub.s32 %v232_v63, %v230_v62 }
 0x3ce   :  { %v234_v5 = vadd.s32 1, %v233_v4 }
 0x3d0   :  { %v235_v6 = vshra.s32 %v234_v5, 1 }
 0x3d2   :  { %v236_v7 = vadd.s32 %v235_v6, %v230_v62 }
 0x3d4   :  { %vm237_vm5 = vcmp.ge.s32.totalorder %v930_v2, %v236_v7  ;;  %vm238_vm7 = vcmp.ge.s32.totalorder %v934_v3, %v236_v7  ;;  %v772_v13 = vadd.s32 4294967295, %v236_v7 }
 0x3d5   :  { %v770_v8 = vsel %vm237_vm5, 1.0, %v885_v0  ;;  %v771_v9 = vsel %vm238_vm7, 1.0, %v885_v0 }
 0x3d6   :  { %v243_v10 = vsel %vm148_vm6, %v770_v8, 0.0  ;;  %v244_v11 = vsel %vm148_vm6, %v771_v9, 0.0 }
 0x3d7   :  { %v245_v12 = vadd.f32 %v244_v11, %v243_v10 }
 0x3d9   :  { %246 = vadd.xlane.f32.xlu1 %v245_v12 }
 0x466   :  { %v247_v14 = vpop.xlane.xlu1 %246 }
 0x467   :  { %vm248_vm8 = vcmp.ge.f32.partialorder %v247_v14, 25.0 }
 0x468   :  { %v249_v15 = vsel %vm248_vm8, %v236_v7, %v230_v62  ;;  %v251_v16 = vsel %vm248_vm8, %v232_v63, %v772_v13 }
 0x469   :  { %v252_v17 = vsub.s32 %v251_v16, %v249_v15 }
 0x46b   :  { %v253_v18 = vadd.s32 1, %v252_v17 }
 0x46d   :  { %v254_v19 = vshra.s32 %v253_v18, 1 }
 0x46f   :  { %v255_v20 = vadd.s32 %v254_v19, %v249_v15 }
 0x471   :  { %vm256_vm9 = vcmp.ge.s32.totalorder %v930_v2, %v255_v20  ;;  %vm257_vm10 = vcmp.ge.s32.totalorder %v934_v3, %v255_v20  ;;  %v775_v25 = vadd.s32 4294967295, %v255_v20 }
 0x472   :  { %v773_v21 = vsel %vm256_vm9, 1.0, %v885_v0  ;;  %v774_v1 = vsel %vm257_vm10, 1.0, %v885_v0 }
 0x473   :  { %v262_v22 = vsel %vm148_vm6, %v773_v21, 0.0  ;;  %v263_v23 = vsel %vm148_vm6, %v774_v1, 0.0 }
 0x474   :  { %v264_v24 = vadd.f32 %v263_v23, %v262_v22 }
 0x476   :  { %265 = vadd.xlane.f32.xlu1 %v264_v24 }
 0x503   :  { %v266_v26 = vpop.xlane.xlu1 %265 }
 0x504   :  { %vm267_vm11 = vcmp.ge.f32.partialorder %v266_v26, 25.0 }
 0x505   :  { %v268_v27 = vsel %vm267_vm11, %v255_v20, %v249_v15  ;;  %v270_v28 = vsel %vm267_vm11, %v251_v16, %v775_v25 }
 0x506   :  { %v271_v29 = vsub.s32 %v270_v28, %v268_v27 }
 0x508   :  { %v272_v30 = vadd.s32 1, %v271_v29 }
 0x50a   :  { %v273_v31 = vshra.s32 %v272_v30, 1 }
 0x50c   :  { %v274_v32 = vadd.s32 %v273_v31, %v268_v27 }
 0x50e   :  { %vm275_vm12 = vcmp.ge.s32.totalorder %v930_v2, %v274_v32  ;;  %vm276_vm13 = vcmp.ge.s32.totalorder %v934_v3, %v274_v32  ;;  %v778_v38 = vadd.s32 4294967295, %v274_v32 }
 0x50f   :  { %v776_v33 = vsel %vm275_vm12, 1.0, %v885_v0  ;;  %v777_v34 = vsel %vm276_vm13, 1.0, %v885_v0 }
 0x510   :  { %v281_v35 = vsel %vm148_vm6, %v776_v33, 0.0  ;;  %v282_v36 = vsel %vm148_vm6, %v777_v34, 0.0 }
 0x511   :  { %v283_v37 = vadd.f32 %v282_v36, %v281_v35 }
 0x513   :  { %284 = vadd.xlane.f32.xlu1 %v283_v37 }
 0x5a0   :  { %v285_v39 = vpop.xlane.xlu1 %284 }
 0x5a1   :  { %vm286_vm14 = vcmp.ge.f32.partialorder %v285_v39, 25.0 }
 0x5a2   :  { %v287_v40 = vsel %vm286_vm14, %v274_v32, %v268_v27  ;;  %v289_v41 = vsel %vm286_vm14, %v270_v28, %v778_v38 }
 0x5a3   :  { %v290_v42 = vsub.s32 %v289_v41, %v287_v40 }
 0x5a5   :  { %v291_v43 = vadd.s32 1, %v290_v42 }
 0x5a7   :  { %v292_v44 = vshra.s32 %v291_v43, 1 }
 0x5a9   :  { %v293_v45 = vadd.s32 %v292_v44, %v287_v40 }
 0x5ab   :  { %vm294_vm15 = vcmp.ge.s32.totalorder %v930_v2, %v293_v45  ;;  %vm295_vm0 = vcmp.ge.s32.totalorder %v934_v3, %v293_v45  ;;  %v781_v51 = vadd.s32 4294967295, %v293_v45 }
 0x5ac   :  { %v779_v46 = vsel %vm294_vm15, 1.0, %v885_v0  ;;  %v780_v47 = vsel %vm295_vm0, 1.0, %v885_v0 }
 0x5ad   :  { %v300_v48 = vsel %vm148_vm6, %v779_v46, 0.0  ;;  %v301_v49 = vsel %vm148_vm6, %v780_v47, 0.0 }
 0x5ae   :  { %v302_v50 = vadd.f32 %v301_v49, %v300_v48 }
 0x5b0   :  { %303 = vadd.xlane.f32.xlu1 %v302_v50 }
 0x63d   :  { %v304_v52 = vpop.xlane.xlu1 %303 }
 0x63e   :  { %vm305_vm1 = vcmp.ge.f32.partialorder %v304_v52, 25.0 }
 0x63f   :  { %v306_v53 = vsel %vm305_vm1, %v293_v45, %v287_v40  ;;  %v308_v54 = vsel %vm305_vm1, %v289_v41, %v781_v51 }
 0x640   :  { %v309_v55 = vsub.s32 %v308_v54, %v306_v53 }
 0x642   :  { %v310_v56 = vadd.s32 1, %v309_v55 }
 0x644   :  { %v311_v57 = vshra.s32 %v310_v56, 1 }
 0x646   :  { %v312_v58 = vadd.s32 %v311_v57, %v306_v53 }
 0x648   :  { %vm313_vm2 = vcmp.ge.s32.totalorder %v930_v2, %v312_v58  ;;  %vm314_vm3 = vcmp.ge.s32.totalorder %v934_v3, %v312_v58  ;;  %v784_v4 = vadd.s32 4294967295, %v312_v58 }
 0x649   :  { %v782_v59 = vsel %vm313_vm2, 1.0, %v885_v0  ;;  %v783_v60 = vsel %vm314_vm3, 1.0, %v885_v0 }
 0x64a   :  { %v319_v61 = vsel %vm148_vm6, %v782_v59, 0.0  ;;  %v320_v62 = vsel %vm148_vm6, %v783_v60, 0.0 }
 0x64b   :  { %v321_v63 = vadd.f32 %v320_v62, %v319_v61 }
 0x64d   :  { %322 = vadd.xlane.f32.xlu1 %v321_v63 }
 0x6da   :  { %v323_v5 = vpop.xlane.xlu1 %322 }
 0x6db   :  { %vm324_vm4 = vcmp.ge.f32.partialorder %v323_v5, 25.0 }
 0x6dc   :  { %v325_v6 = vsel %vm324_vm4, %v312_v58, %v306_v53  ;;  %v327_v7 = vsel %vm324_vm4, %v308_v54, %v784_v4 }
 0x6dd   :  { %v328_v8 = vsub.s32 %v327_v7, %v325_v6 }
 0x6df   :  { %v329_v9 = vadd.s32 1, %v328_v8 }
 0x6e1   :  { %v330_v10 = vshra.s32 %v329_v9, 1 }
 0x6e3   :  { %v331_v11 = vadd.s32 %v330_v10, %v325_v6 }
 0x6e5   :  { %vm332_vm5 = vcmp.ge.s32.totalorder %v930_v2, %v331_v11  ;;  %vm333_vm7 = vcmp.ge.s32.totalorder %v934_v3, %v331_v11  ;;  %v787_v17 = vadd.s32 4294967295, %v331_v11 }
 0x6e6   :  { %v785_v12 = vsel %vm332_vm5, 1.0, %v885_v0  ;;  %v786_v13 = vsel %vm333_vm7, 1.0, %v885_v0 }
 0x6e7   :  { %v338_v14 = vsel %vm148_vm6, %v785_v12, 0.0  ;;  %v339_v15 = vsel %vm148_vm6, %v786_v13, 0.0 }
 0x6e8   :  { %v340_v16 = vadd.f32 %v339_v15, %v338_v14 }
 0x6ea   :  { %341 = vadd.xlane.f32.xlu0 %v340_v16 }
 0x777   :  { %v342_v18 = vpop.xlane.xlu0 %341 }
 0x778   :  { %vm343_vm8 = vcmp.ge.f32.partialorder %v342_v18, 25.0 }
 0x779   :  { %v344_v19 = vsel %vm343_vm8, %v331_v11, %v325_v6  ;;  %v346_v20 = vsel %vm343_vm8, %v327_v7, %v787_v17 }
 0x77a   :  { %v347_v21 = vsub.s32 %v346_v20, %v344_v19 }
 0x77c   :  { %v348_v1 = vadd.s32 1, %v347_v21 }
 0x77e   :  { %v349_v22 = vshra.s32 %v348_v1, 1 }
 0x780   :  { %v350_v23 = vadd.s32 %v349_v22, %v344_v19 }
 0x782   :  { %vm351_vm9 = vcmp.ge.s32.totalorder %v930_v2, %v350_v23  ;;  %vm352_vm10 = vcmp.ge.s32.totalorder %v934_v3, %v350_v23  ;;  %v790_v29 = vadd.s32 4294967295, %v350_v23 }
 0x783   :  { %v788_v24 = vsel %vm351_vm9, 1.0, %v885_v0  ;;  %v789_v25 = vsel %vm352_vm10, 1.0, %v885_v0 }
 0x784   :  { %v357_v26 = vsel %vm148_vm6, %v788_v24, 0.0  ;;  %v358_v27 = vsel %vm148_vm6, %v789_v25, 0.0 }
 0x785   :  { %v359_v28 = vadd.f32 %v358_v27, %v357_v26 }
 0x787   :  { %360 = vadd.xlane.f32.xlu1 %v359_v28 }
 0x814   :  { %v361_v30 = vpop.xlane.xlu1 %360 }
 0x815   :  { %vm362_vm11 = vcmp.ge.f32.partialorder %v361_v30, 25.0 }
 0x816   :  { %v363_v31 = vsel %vm362_vm11, %v350_v23, %v344_v19  ;;  %v365_v32 = vsel %vm362_vm11, %v346_v20, %v790_v29 }
 0x817   :  { %v366_v33 = vsub.s32 %v365_v32, %v363_v31 }
 0x819   :  { %v367_v34 = vadd.s32 1, %v366_v33 }
 0x81b   :  { %v368_v35 = vshra.s32 %v367_v34, 1 }
 0x81d   :  { %v369_v36 = vadd.s32 %v368_v35, %v363_v31 }
 0x81f   :  { %vm370_vm12 = vcmp.ge.s32.totalorder %v930_v2, %v369_v36  ;;  %vm371_vm13 = vcmp.ge.s32.totalorder %v934_v3, %v369_v36  ;;  %v793_v42 = vadd.s32 4294967295, %v369_v36 }
 0x820   :  { %v791_v37 = vsel %vm370_vm12, 1.0, %v885_v0  ;;  %v792_v38 = vsel %vm371_vm13, 1.0, %v885_v0 }
 0x821   :  { %v376_v39 = vsel %vm148_vm6, %v791_v37, 0.0  ;;  %v377_v40 = vsel %vm148_vm6, %v792_v38, 0.0 }
 0x822   :  { %v378_v41 = vadd.f32 %v377_v40, %v376_v39 }
 0x824   :  { %379 = vadd.xlane.f32.xlu0 %v378_v41 }
 0x8b1   :  { %v380_v43 = vpop.xlane.xlu0 %379 }
 0x8b2   :  { %vm381_vm14 = vcmp.ge.f32.partialorder %v380_v43, 25.0 }
 0x8b3   :  { %v382_v44 = vsel %vm381_vm14, %v369_v36, %v363_v31  ;;  %v384_v45 = vsel %vm381_vm14, %v365_v32, %v793_v42 }
 0x8b4   :  { %v385_v46 = vsub.s32 %v384_v45, %v382_v44 }
 0x8b6   :  { %v386_v47 = vadd.s32 1, %v385_v46 }
 0x8b8   :  { %v387_v48 = vshra.s32 %v386_v47, 1 }
 0x8ba   :  { %v388_v49 = vadd.s32 %v387_v48, %v382_v44 }
 0x8bc   :  { %vm389_vm15 = vcmp.ge.s32.totalorder %v930_v2, %v388_v49  ;;  %vm390_vm0 = vcmp.ge.s32.totalorder %v934_v3, %v388_v49  ;;  %v796_v55 = vadd.s32 4294967295, %v388_v49 }
 0x8bd   :  { %v794_v50 = vsel %vm389_vm15, 1.0, %v885_v0  ;;  %v795_v51 = vsel %vm390_vm0, 1.0, %v885_v0 }
 0x8be   :  { %v395_v52 = vsel %vm148_vm6, %v794_v50, 0.0  ;;  %v396_v53 = vsel %vm148_vm6, %v795_v51, 0.0 }
 0x8bf   :  { %v397_v54 = vadd.f32 %v396_v53, %v395_v52 }
 0x8c1   :  { %398 = vadd.xlane.f32.xlu1 %v397_v54 }
 0x94e   :  { %v399_v56 = vpop.xlane.xlu1 %398 }
 0x94f   :  { %vm400_vm1 = vcmp.ge.f32.partialorder %v399_v56, 25.0 }
 0x950   :  { %v401_v57 = vsel %vm400_vm1, %v388_v49, %v382_v44  ;;  %v403_v58 = vsel %vm400_vm1, %v384_v45, %v796_v55 }
 0x951   :  { %v404_v59 = vsub.s32 %v403_v58, %v401_v57 }
 0x953   :  { %v405_v60 = vadd.s32 1, %v404_v59 }
 0x955   :  { %v406_v61 = vshra.s32 %v405_v60, 1 }
 0x957   :  { %v407_v62 = vadd.s32 %v406_v61, %v401_v57 }
 0x959   :  { %vm408_vm2 = vcmp.ge.s32.totalorder %v930_v2, %v407_v62  ;;  %vm409_vm3 = vcmp.ge.s32.totalorder %v934_v3, %v407_v62  ;;  %v799_v8 = vadd.s32 4294967295, %v407_v62 }
 0x95a   :  { %v797_v63 = vsel %vm408_vm2, 1.0, %v885_v0  ;;  %v798_v4 = vsel %vm409_vm3, 1.0, %v885_v0 }
 0x95b   :  { %v414_v5 = vsel %vm148_vm6, %v797_v63, 0.0  ;;  %v415_v6 = vsel %vm148_vm6, %v798_v4, 0.0 }
 0x95c   :  { %v416_v7 = vadd.f32 %v415_v6, %v414_v5 }
 0x95e   :  { %417 = vadd.xlane.f32.xlu0 %v416_v7 }
 0x9eb   :  { %v418_v9 = vpop.xlane.xlu0 %417 }
 0x9ec   :  { %vm419_vm4 = vcmp.ge.f32.partialorder %v418_v9, 25.0 }
 0x9ed   :  { %v420_v10 = vsel %vm419_vm4, %v407_v62, %v401_v57  ;;  %v422_v11 = vsel %vm419_vm4, %v403_v58, %v799_v8 }
 0x9ee   :  { %v423_v12 = vsub.s32 %v422_v11, %v420_v10 }
 0x9f0   :  { %v424_v13 = vadd.s32 1, %v423_v12 }
 0x9f2   :  { %v425_v14 = vshra.s32 %v424_v13, 1 }
 0x9f4   :  { %v426_v15 = vadd.s32 %v425_v14, %v420_v10 }
 0x9f6   :  { %vm427_vm5 = vcmp.ge.s32.totalorder %v930_v2, %v426_v15  ;;  %vm428_vm7 = vcmp.ge.s32.totalorder %v934_v3, %v426_v15  ;;  %v802_v21 = vadd.s32 4294967295, %v426_v15 }
 0x9f7   :  { %v800_v16 = vsel %vm427_vm5, 1.0, %v885_v0  ;;  %v801_v17 = vsel %vm428_vm7, 1.0, %v885_v0 }
 0x9f8   :  { %v433_v18 = vsel %vm148_vm6, %v800_v16, 0.0  ;;  %v434_v19 = vsel %vm148_vm6, %v801_v17, 0.0 }
 0x9f9   :  { %v435_v20 = vadd.f32 %v434_v19, %v433_v18 }
 0x9fb   :  { %436 = vadd.xlane.f32.xlu1 %v435_v20 }
 0xa88   :  { %v437_v1 = vpop.xlane.xlu1 %436 }
 0xa89   :  { %vm438_vm8 = vcmp.ge.f32.partialorder %v437_v1, 25.0 }
 0xa8a   :  { %v439_v22 = vsel %vm438_vm8, %v426_v15, %v420_v10  ;;  %v441_v23 = vsel %vm438_vm8, %v422_v11, %v802_v21 }
 0xa8b   :  { %v442_v24 = vsub.s32 %v441_v23, %v439_v22 }
 0xa8d   :  { %v443_v25 = vadd.s32 1, %v442_v24 }
 0xa8f   :  { %v444_v26 = vshra.s32 %v443_v25, 1 }
 0xa91   :  { %v445_v27 = vadd.s32 %v444_v26, %v439_v22 }
 0xa93   :  { %vm446_vm9 = vcmp.ge.s32.totalorder %v930_v2, %v445_v27  ;;  %vm447_vm10 = vcmp.ge.s32.totalorder %v934_v3, %v445_v27  ;;  %v805_v33 = vadd.s32 4294967295, %v445_v27 }
 0xa94   :  { %v803_v28 = vsel %vm446_vm9, 1.0, %v885_v0  ;;  %v804_v29 = vsel %vm447_vm10, 1.0, %v885_v0 }
 0xa95   :  { %v452_v30 = vsel %vm148_vm6, %v803_v28, 0.0  ;;  %v453_v31 = vsel %vm148_vm6, %v804_v29, 0.0 }
 0xa96   :  { %v454_v32 = vadd.f32 %v453_v31, %v452_v30 }
 0xa98   :  { %455 = vadd.xlane.f32.xlu0 %v454_v32 }
 0xb25   :  { %v456_v34 = vpop.xlane.xlu0 %455 }
 0xb26   :  { %vm457_vm11 = vcmp.ge.f32.partialorder %v456_v34, 25.0 }
 0xb27   :  { %v458_v35 = vsel %vm457_vm11, %v445_v27, %v439_v22  ;;  %v460_v36 = vsel %vm457_vm11, %v441_v23, %v805_v33 }
 0xb28   :  { %v461_v37 = vsub.s32 %v460_v36, %v458_v35 }
 0xb2a   :  { %v462_v38 = vadd.s32 1, %v461_v37 }
 0xb2c   :  { %v463_v39 = vshra.s32 %v462_v38, 1 }
 0xb2e   :  { %v464_v40 = vadd.s32 %v463_v39, %v458_v35 }
 0xb30   :  { %vm465_vm12 = vcmp.ge.s32.totalorder %v930_v2, %v464_v40  ;;  %vm466_vm13 = vcmp.ge.s32.totalorder %v934_v3, %v464_v40  ;;  %v808_v46 = vadd.s32 4294967295, %v464_v40 }
 0xb31   :  { %v806_v41 = vsel %vm465_vm12, 1.0, %v885_v0  ;;  %v807_v42 = vsel %vm466_vm13, 1.0, %v885_v0 }
 0xb32   :  { %v471_v43 = vsel %vm148_vm6, %v806_v41, 0.0  ;;  %v472_v44 = vsel %vm148_vm6, %v807_v42, 0.0 }
 0xb33   :  { %v473_v45 = vadd.f32 %v472_v44, %v471_v43 }
 0xb35   :  { %474 = vadd.xlane.f32.xlu1 %v473_v45 }
 0xbc2   :  { %v475_v47 = vpop.xlane.xlu1 %474 }
 0xbc3   :  { %vm476_vm14 = vcmp.ge.f32.partialorder %v475_v47, 25.0 }
 0xbc4   :  { %v477_v48 = vsel %vm476_vm14, %v464_v40, %v458_v35  ;;  %v479_v49 = vsel %vm476_vm14, %v460_v36, %v808_v46 }
 0xbc5   :  { %v480_v50 = vsub.s32 %v479_v49, %v477_v48 }
 0xbc7   :  { %v481_v51 = vadd.s32 1, %v480_v50 }
 0xbc9   :  { %v482_v52 = vshra.s32 %v481_v51, 1 }
 0xbcb   :  { %v483_v53 = vadd.s32 %v482_v52, %v477_v48 }
 0xbcd   :  { %vm484_vm15 = vcmp.ge.s32.totalorder %v930_v2, %v483_v53  ;;  %vm485_vm0 = vcmp.ge.s32.totalorder %v934_v3, %v483_v53  ;;  %v811_v59 = vadd.s32 4294967295, %v483_v53 }
 0xbce   :  { %v809_v54 = vsel %vm484_vm15, 1.0, %v885_v0  ;;  %v810_v55 = vsel %vm485_vm0, 1.0, %v885_v0 }
 0xbcf   :  { %v490_v56 = vsel %vm148_vm6, %v809_v54, 0.0  ;;  %v491_v57 = vsel %vm148_vm6, %v810_v55, 0.0 }
 0xbd0   :  { %v492_v58 = vadd.f32 %v491_v57, %v490_v56 }
 0xbd2   :  { %493 = vadd.xlane.f32.xlu0 %v492_v58 }
 0xc5f   :  { %v494_v60 = vpop.xlane.xlu0 %493 }
 0xc60   :  { %vm495_vm1 = vcmp.ge.f32.partialorder %v494_v60, 25.0 }
 0xc61   :  { %v496_v61 = vsel %vm495_vm1, %v483_v53, %v477_v48  ;;  %v498_v62 = vsel %vm495_vm1, %v479_v49, %v811_v59 }
 0xc62   :  { %v499_v63 = vsub.s32 %v498_v62, %v496_v61 }
 0xc64   :  { %v500_v4 = vadd.s32 1, %v499_v63 }
 0xc66   :  { %v501_v5 = vshra.s32 %v500_v4, 1 }
 0xc68   :  { %v502_v6 = vadd.s32 %v501_v5, %v496_v61 }
 0xc6a   :  { %vm503_vm2 = vcmp.ge.s32.totalorder %v930_v2, %v502_v6  ;;  %vm504_vm3 = vcmp.ge.s32.totalorder %v934_v3, %v502_v6  ;;  %v814_v12 = vadd.s32 4294967295, %v502_v6 }
 0xc6b   :  { %v812_v7 = vsel %vm503_vm2, 1.0, %v885_v0  ;;  %v813_v8 = vsel %vm504_vm3, 1.0, %v885_v0 }
 0xc6c   :  { %v509_v9 = vsel %vm148_vm6, %v812_v7, 0.0  ;;  %v510_v10 = vsel %vm148_vm6, %v813_v8, 0.0 }
 0xc6d   :  { %v511_v11 = vadd.f32 %v510_v10, %v509_v9 }
 0xc6f   :  { %512 = vadd.xlane.f32.xlu1 %v511_v11 }
 0xcfc   :  { %v513_v13 = vpop.xlane.xlu1 %512 }
 0xcfd   :  { %vm514_vm4 = vcmp.ge.f32.partialorder %v513_v13, 25.0 }
 0xcfe   :  { %v515_v14 = vsel %vm514_vm4, %v502_v6, %v496_v61  ;;  %v517_v15 = vsel %vm514_vm4, %v498_v62, %v814_v12 }
 0xcff   :  { %v518_v16 = vsub.s32 %v517_v15, %v515_v14 }
 0xd01   :  { %v519_v17 = vadd.s32 1, %v518_v16 }
 0xd03   :  { %v520_v18 = vshra.s32 %v519_v17, 1 }
 0xd05   :  { %v521_v19 = vadd.s32 %v520_v18, %v515_v14 }
 0xd07   :  { %vm522_vm5 = vcmp.ge.s32.totalorder %v930_v2, %v521_v19  ;;  %vm523_vm7 = vcmp.ge.s32.totalorder %v934_v3, %v521_v19  ;;  %v817_v24 = vadd.s32 4294967295, %v521_v19 }
 0xd08   :  { %v815_v20 = vsel %vm522_vm5, 1.0, %v885_v0  ;;  %v816_v21 = vsel %vm523_vm7, 1.0, %v885_v0 }
 0xd09   :  { %v528_v1 = vsel %vm148_vm6, %v815_v20, 0.0  ;;  %v529_v22 = vsel %vm148_vm6, %v816_v21, 0.0 }
 0xd0a   :  { %v530_v23 = vadd.f32 %v529_v22, %v528_v1 }
 0xd0c   :  { %531 = vadd.xlane.f32.xlu0 %v530_v23 }
 0xd99   :  { %v532_v25 = vpop.xlane.xlu0 %531 }
 0xd9a   :  { %vm533_vm8 = vcmp.ge.f32.partialorder %v532_v25, 25.0 }
 0xd9b   :  { %v534_v26 = vsel %vm533_vm8, %v521_v19, %v515_v14  ;;  %v536_v27 = vsel %vm533_vm8, %v517_v15, %v817_v24 }
 0xd9c   :  { %v537_v28 = vsub.s32 %v536_v27, %v534_v26 }
 0xd9e   :  { %v538_v29 = vadd.s32 1, %v537_v28 }
 0xda0   :  { %v539_v30 = vshra.s32 %v538_v29, 1 }
 0xda2   :  { %v540_v31 = vadd.s32 %v539_v30, %v534_v26 }
 0xda4   :  { %vm541_vm9 = vcmp.ge.s32.totalorder %v930_v2, %v540_v31  ;;  %vm542_vm10 = vcmp.ge.s32.totalorder %v934_v3, %v540_v31  ;;  %v820_v37 = vadd.s32 4294967295, %v540_v31 }
 0xda5   :  { %v818_v32 = vsel %vm541_vm9, 1.0, %v885_v0  ;;  %v819_v33 = vsel %vm542_vm10, 1.0, %v885_v0 }
 0xda6   :  { %v547_v34 = vsel %vm148_vm6, %v818_v32, 0.0  ;;  %v548_v35 = vsel %vm148_vm6, %v819_v33, 0.0 }
 0xda7   :  { %v549_v36 = vadd.f32 %v548_v35, %v547_v34 }
 0xda9   :  { %550 = vadd.xlane.f32.xlu1 %v549_v36 }
 0xe36   :  { %v551_v38 = vpop.xlane.xlu1 %550 }
 0xe37   :  { %vm552_vm11 = vcmp.ge.f32.partialorder %v551_v38, 25.0 }
 0xe38   :  { %v553_v39 = vsel %vm552_vm11, %v540_v31, %v534_v26  ;;  %v555_v40 = vsel %vm552_vm11, %v536_v27, %v820_v37 }
 0xe39   :  { %v556_v41 = vsub.s32 %v555_v40, %v553_v39 }
 0xe3b   :  { %v557_v42 = vadd.s32 1, %v556_v41 }
 0xe3d   :  { %v558_v43 = vshra.s32 %v557_v42, 1 }
 0xe3f   :  { %v559_v44 = vadd.s32 %v558_v43, %v553_v39 }
 0xe41   :  { %vm560_vm12 = vcmp.ge.s32.totalorder %v930_v2, %v559_v44  ;;  %vm561_vm13 = vcmp.ge.s32.totalorder %v934_v3, %v559_v44  ;;  %v823_v50 = vadd.s32 4294967295, %v559_v44 }
 0xe42   :  { %v821_v45 = vsel %vm560_vm12, 1.0, %v885_v0  ;;  %v822_v46 = vsel %vm561_vm13, 1.0, %v885_v0 }
 0xe43   :  { %v566_v47 = vsel %vm148_vm6, %v821_v45, 0.0  ;;  %v567_v48 = vsel %vm148_vm6, %v822_v46, 0.0 }
 0xe44   :  { %v568_v49 = vadd.f32 %v567_v48, %v566_v47 }
 0xe46   :  { %569 = vadd.xlane.f32.xlu0 %v568_v49 }
 0xed3   :  { %v570_v51 = vpop.xlane.xlu0 %569 }
 0xed4   :  { %vm571_vm14 = vcmp.ge.f32.partialorder %v570_v51, 25.0 }
 0xed5   :  { %v572_v52 = vsel %vm571_vm14, %v559_v44, %v553_v39  ;;  %v574_v53 = vsel %vm571_vm14, %v555_v40, %v823_v50 }
 0xed6   :  { %v575_v54 = vsub.s32 %v574_v53, %v572_v52 }
 0xed8   :  { %v576_v55 = vadd.s32 1, %v575_v54 }
 0xeda   :  { %v577_v56 = vshra.s32 %v576_v55, 1 }
 0xedc   :  { %v578_v57 = vadd.s32 %v577_v56, %v572_v52 }
 0xede   :  { %vm579_vm15 = vcmp.ge.s32.totalorder %v930_v2, %v578_v57  ;;  %vm580_vm0 = vcmp.ge.s32.totalorder %v934_v3, %v578_v57  ;;  %v826_v63 = vadd.s32 4294967295, %v578_v57 }
 0xedf   :  { %v824_v58 = vsel %vm579_vm15, 1.0, %v885_v0  ;;  %v825_v59 = vsel %vm580_vm0, 1.0, %v885_v0 }
 0xee0   :  { %v585_v60 = vsel %vm148_vm6, %v824_v58, 0.0  ;;  %v586_v61 = vsel %vm148_vm6, %v825_v59, 0.0 }
 0xee1   :  { %v587_v62 = vadd.f32 %v586_v61, %v585_v60 }
 0xee3   :  { %588 = vadd.xlane.f32.xlu1 %v587_v62 }
 0xf70   :  { %v589_v4 = vpop.xlane.xlu1 %588 }
 0xf71   :  { %vm590_vm1 = vcmp.ge.f32.partialorder %v589_v4, 25.0 }
 0xf72   :  { %v591_v5 = vsel %vm590_vm1, %v578_v57, %v572_v52  ;;  %v593_v6 = vsel %vm590_vm1, %v574_v53, %v826_v63 }
 0xf73   :  { %v594_v7 = vsub.s32 %v593_v6, %v591_v5 }
 0xf75   :  { %v595_v8 = vadd.s32 1, %v594_v7 }
 0xf77   :  { %v596_v9 = vshra.s32 %v595_v8, 1 }
 0xf79   :  { %v597_v10 = vadd.s32 %v596_v9, %v591_v5 }
 0xf7b   :  { %vm598_vm2 = vcmp.ge.s32.totalorder %v930_v2, %v597_v10  ;;  %vm599_vm3 = vcmp.ge.s32.totalorder %v934_v3, %v597_v10  ;;  %v829_v16 = vadd.s32 4294967295, %v597_v10 }
 0xf7c   :  { %v827_v11 = vsel %vm598_vm2, 1.0, %v885_v0  ;;  %v828_v12 = vsel %vm599_vm3, 1.0, %v885_v0 }
 0xf7d   :  { %v604_v13 = vsel %vm148_vm6, %v827_v11, 0.0  ;;  %v605_v14 = vsel %vm148_vm6, %v828_v12, 0.0 }
 0xf7e   :  { %v606_v15 = vadd.f32 %v605_v14, %v604_v13 }
 0xf80   :  { %607 = vadd.xlane.f32.xlu0 %v606_v15 }
0x100d   :  { %v608_v17 = vpop.xlane.xlu0 %607 }
0x100e   :  { %vm609_vm4 = vcmp.ge.f32.partialorder %v608_v17, 25.0 }
0x100f   :  { %v610_v18 = vsel %vm609_vm4, %v597_v10, %v591_v5  ;;  %v612_v19 = vsel %vm609_vm4, %v593_v6, %v829_v16 }
0x1010   :  { %v613_v20 = vsub.s32 %v612_v19, %v610_v18 }
0x1012   :  { %v614_v21 = vadd.s32 1, %v613_v20 }
0x1014   :  { %v615_v1 = vshra.s32 %v614_v21, 1 }
0x1016   :  { %v616_v22 = vadd.s32 %v615_v1, %v610_v18 }
0x1018   :  { %vm617_vm5 = vcmp.ge.s32.totalorder %v930_v2, %v616_v22  ;;  %vm618_vm7 = vcmp.ge.s32.totalorder %v934_v3, %v616_v22  ;;  %v832_v28 = vadd.s32 4294967295, %v616_v22 }
0x1019   :  { %v830_v23 = vsel %vm617_vm5, 1.0, %v885_v0  ;;  %v831_v24 = vsel %vm618_vm7, 1.0, %v885_v0 }
0x101a   :  { %v623_v25 = vsel %vm148_vm6, %v830_v23, 0.0  ;;  %v624_v26 = vsel %vm148_vm6, %v831_v24, 0.0 }
0x101b   :  { %v625_v27 = vadd.f32 %v624_v26, %v623_v25 }
0x101d   :  { %626 = vadd.xlane.f32.xlu1 %v625_v27 }
0x10aa   :  { %v627_v29 = vpop.xlane.xlu1 %626 }
0x10ab   :  { %vm628_vm8 = vcmp.ge.f32.partialorder %v627_v29, 25.0 }
0x10ac   :  { %v629_v30 = vsel %vm628_vm8, %v616_v22, %v610_v18  ;;  %v631_v31 = vsel %vm628_vm8, %v612_v19, %v832_v28 }
0x10ad   :  { %v632_v32 = vsub.s32 %v631_v31, %v629_v30 }
0x10af   :  { %v633_v33 = vadd.s32 1, %v632_v32 }
0x10b1   :  { %v634_v34 = vshra.s32 %v633_v33, 1 }
0x10b3   :  { %v635_v35 = vadd.s32 %v634_v34, %v629_v30 }
0x10b5   :  { %vm636_vm9 = vcmp.ge.s32.totalorder %v930_v2, %v635_v35  ;;  %vm637_vm10 = vcmp.ge.s32.totalorder %v934_v3, %v635_v35  ;;  %v835_v41 = vadd.s32 4294967295, %v635_v35 }
0x10b6   :  { %v833_v36 = vsel %vm636_vm9, 1.0, %v885_v0  ;;  %v834_v37 = vsel %vm637_vm10, 1.0, %v885_v0 }
0x10b7   :  { %v642_v38 = vsel %vm148_vm6, %v833_v36, 0.0  ;;  %v643_v39 = vsel %vm148_vm6, %v834_v37, 0.0 }
0x10b8   :  { %v644_v40 = vadd.f32 %v643_v39, %v642_v38 }
0x10ba   :  { %645 = vadd.xlane.f32.xlu0 %v644_v40 }
0x1147   :  { %v646_v42 = vpop.xlane.xlu0 %645 }
0x1148   :  { %vm647_vm11 = vcmp.ge.f32.partialorder %v646_v42, 25.0 }
0x1149   :  { %v648_v43 = vsel %vm647_vm11, %v635_v35, %v629_v30  ;;  %v650_v44 = vsel %vm647_vm11, %v631_v31, %v835_v41  ;;  %vm749_vm11 = vcmask 1024  }
0x114a   :  { %v651_v45 = vsub.s32 %v650_v44, %v648_v43 }
0x114c   :  { %v652_v46 = vadd.s32 1, %v651_v45 }
0x114e   :  { %v653_v47 = vshra.s32 %v652_v46, 1 }
0x1150   :  { %v654_v48 = vadd.s32 %v653_v47, %v648_v43 }
0x1152   :  { %vm655_vm12 = vcmp.ge.s32.totalorder %v930_v2, %v654_v48  ;;  %vm656_vm13 = vcmp.ge.s32.totalorder %v934_v3, %v654_v48  ;;  %v838_v54 = vadd.s32 4294967295, %v654_v48 }
0x1153   :  { %v836_v49 = vsel %vm655_vm12, 1.0, %v885_v0  ;;  %v837_v50 = vsel %vm656_vm13, 1.0, %v885_v0 }
0x1154   :  { %v661_v51 = vsel %vm148_vm6, %v836_v49, 0.0  ;;  %v662_v52 = vsel %vm148_vm6, %v837_v50, 0.0 }
0x1155   :  { %v663_v53 = vadd.f32 %v662_v52, %v661_v51 }
0x1157   :  { %664 = vadd.xlane.f32.xlu1 %v663_v53 }
0x11e4   :  { %v665_v55 = vpop.xlane.xlu1 %664 }
0x11e5   :  { %vm666_vm14 = vcmp.ge.f32.partialorder %v665_v55, 25.0 }
0x11e6   :  { %v667_v56 = vsel %vm666_vm14, %v654_v48, %v648_v43  ;;  %v669_v57 = vsel %vm666_vm14, %v650_v44, %v838_v54 }
0x11e7   :  { %v670_v58 = vsub.s32 %v669_v57, %v667_v56 }
0x11e9   :  { %v671_v59 = vadd.s32 1, %v670_v58 }
0x11eb   :  { %v672_v60 = vshra.s32 %v671_v59, 1 }
0x11ed   :  { %v673_v61 = vadd.s32 %v672_v60, %v667_v56 }
0x11ef   :  { %vm674_vm15 = vcmp.ge.s32.totalorder %v930_v2, %v673_v61  ;;  %vm675_vm0 = vcmp.ge.s32.totalorder %v934_v3, %v673_v61  ;;  %v841_v7 = vadd.s32 4294967295, %v673_v61 }
0x11f0   :  { %v839_v62 = vsel %vm674_vm15, 1.0, %v885_v0  ;;  %v840_v63 = vsel %vm675_vm0, 1.0, %v885_v0 }
0x11f1   :  { %v680_v4 = vsel %vm148_vm6, %v839_v62, 0.0  ;;  %v681_v5 = vsel %vm148_vm6, %v840_v63, 0.0 }
0x11f2   :  { %v682_v6 = vadd.f32 %v681_v5, %v680_v4 }
0x11f4   :  { %683 = vadd.xlane.f32.xlu0 %v682_v6 }
0x1281   :  { %v684_v8 = vpop.xlane.xlu0 %683 }
0x1282   :  { %vm685_vm1 = vcmp.ge.f32.partialorder %v684_v8, 25.0 }
0x1283   :  { %v686_v9 = vsel %vm685_vm1, %v673_v61, %v667_v56  ;;  %v688_v10 = vsel %vm685_vm1, %v669_v57, %v841_v7 }
0x1284   :  { %v689_v11 = vsub.s32 %v688_v10, %v686_v9 }
0x1286   :  { %v690_v12 = vadd.s32 1, %v689_v11 }
0x1288   :  { %v691_v13 = vshra.s32 %v690_v12, 1 }
0x128a   :  { %v692_v14 = vadd.s32 %v691_v13, %v686_v9 }
0x128c   :  { %vm693_vm2 = vcmp.ge.s32.totalorder %v930_v2, %v692_v14  ;;  %vm694_vm3 = vcmp.ge.s32.totalorder %v934_v3, %v692_v14  ;;  %v844_v20 = vadd.s32 4294967295, %v692_v14 }
0x128d   :  { %v842_v15 = vsel %vm693_vm2, 1.0, %v885_v0  ;;  %v843_v16 = vsel %vm694_vm3, 1.0, %v885_v0 }
0x128e   :  { %v699_v17 = vsel %vm148_vm6, %v842_v15, 0.0  ;;  %v700_v18 = vsel %vm148_vm6, %v843_v16, 0.0 }
0x128f   :  { %v701_v19 = vadd.f32 %v700_v18, %v699_v17 }
0x1291   :  { %702 = vadd.xlane.f32.xlu1 %v701_v19 }
0x131e   :  { %v703_v21 = vpop.xlane.xlu1 %702 }
0x131f   :  { %vm704_vm4 = vcmp.ge.f32.partialorder %v703_v21, 25.0 }
0x1320   :  { %v705_v1 = vsel %vm704_vm4, %v692_v14, %v686_v9  ;;  %v707_v22 = vsel %vm704_vm4, %v688_v10, %v844_v20 }
0x1321   :  { %v708_v23 = vsub.s32 %v707_v22, %v705_v1 }
0x1323   :  { %v709_v24 = vadd.s32 1, %v708_v23 }
0x1325   :  { %v710_v25 = vshra.s32 %v709_v24, 1 }
0x1327   :  { %v711_v26 = vadd.s32 %v710_v25, %v705_v1 }
0x1329   :  { %vm712_vm5 = vcmp.ge.s32.totalorder %v930_v2, %v711_v26  ;;  %vm713_vm7 = vcmp.ge.s32.totalorder %v934_v3, %v711_v26 }
0x132a   :  { %v845_v27 = vsel %vm712_vm5, 1.0, %v885_v0  ;;  %v846_v28 = vsel %vm713_vm7, 1.0, %v885_v0 }
0x132b   :  { %v718_v29 = vsel %vm148_vm6, %v845_v27, 0.0  ;;  %v719_v30 = vsel %vm148_vm6, %v846_v28, 0.0 }
0x132c   :  { %v720_v31 = vadd.f32 %v719_v30, %v718_v29 }
0x132e   :  { %721 = vadd.xlane.f32.xlu0 %v720_v31 }
0x13bb   :  { %v722_v32 = vpop.xlane.xlu0 %721 }
0x13bc   :  { %vm723_vm8 = vcmp.ge.f32.partialorder %v722_v32, 25.0 }
0x13bd   :  { %v724_v33 = vsel %vm723_vm8, %v711_v26, %v705_v1 }
0x13be   :  { %vm726_vm9 = vcmp.gt.s32.totalorder %v930_v2, %v724_v33  ;;  %vm727_vm10 = vcmp.gt.s32.totalorder %v934_v3, %v724_v33 }
0x13bf   :  { %v737_v34 = vsel %vm726_vm9, %v930_v2, 0.0  ;;  %v738_v35 = vsel %vm727_vm10, %v934_v3, 0.0  ;;  %v847_v36 = vsel %vm726_vm9, 1.0, %v885_v0  ;;  %v848_v37 = vsel %vm727_vm10, 1.0, %v885_v0 }
0x13c0   :  { %v739_v38 = vsel %vm148_vm6, %v737_v34, 0.0  ;;  %v740_v39 = vsel %vm148_vm6, %v738_v35, 0.0  ;;  %v732_v40 = vsel %vm148_vm6, %v847_v36, 0.0  ;;  %v733_v41 = vsel %vm148_vm6, %v848_v37, 0.0 }
0x13c1   :  { %v741_v42 = vadd.f32 %v740_v39, %v739_v38  ;;  %v734_v43 = vadd.f32 %v733_v41, %v732_v40 }
0x13c3   :  { %742 = vadd.xlane.f32.xlu0 %v741_v42  ;;  %735 = vadd.xlane.f32.xlu1 %v734_v43 }
0x1450   :  { %v736_v44 = vpop.xlane.xlu1 %735  ;;  %v743_v3 = vpop.xlane.xlu0 %742 }
0x1451   :  { %v744_v2 = vsub.f32 25.0, %v736_v44 }
0x1453   :  { %v745_v45 = vmul.f32 %v744_v2, %v724_v33 }
0x1455   :  { %v746_v46 = vadd.f32 %v745_v45, %v743_v3 }
0x1457   :  { %v748_v47 = vmul.f32 0.04, %v746_v46 }
0x1459   :  { %750 = vst.msk [vmem:[%s1139_s3] sm:$0x3] %vm749_vm11, %v748_v47 }
0x145a   :  { %755 = vsyncpa [#allocation5], 1 }

</bundles_post_ra>
